<compile_context>
chip_gen: v6e
topology: v6e:2x2x1
jax: 0.10.0
libtpu: 0.0.40
codegen_flags: <defaults>
</compile_context>

<pallas_src>
import functools
import numpy as np

import jax
import jax.numpy as jnp
from jax import lax
from jax.experimental import pallas as pl
from jax.experimental.pallas import tpu as pltpu


# ---------------------------------------------------------------------------
# Kernel
# ---------------------------------------------------------------------------
def _encoder_layer_kernel(
    src_kv_ref,                     # (1, S, D)  bf16   full sequence (K/V source)
    src_q_ref,                      # (1, TQ, D) f32    query tile (residual path)
    wq_ref, bq_ref,                 # (D, D) bf16, (1, D) f32
    wkv_ref, bkv_ref,               # (D, 2D) bf16, (1, 2D) f32   (fused K|V)
    wo_ref, bo_ref,                 # (D, D) bf16, (1, D) f32
    w1_ref, b1_ref,                 # (D, F) bf16, (1, F) f32
    w2_ref, b2_ref,                 # (F, D) bf16, (1, D) f32
    g1_ref, be1_ref, g2_ref, be2_ref,   # (1, D) f32 LayerNorm params
    out_ref,                        # (1, TQ, D)
    kv_scratch,                     # (S, 2D) bf16 persistent VMEM: [K | V]
    *, num_heads: int, eps: float = 1e-5,
):
    f32, bf16 = jnp.float32, jnp.bfloat16
    S = src_kv_ref.shape[1]
    TQ = src_q_ref.shape[1]
    D = wq_ref.shape[0]
    d_k = D // num_heads
    qi = pl.program_id(1)

    def layer_norm(v, g_ref, b_ref):
        mu = jnp.mean(v, axis=-1, keepdims=True)
        var = jnp.mean((v - mu) ** 2, axis=-1, keepdims=True)
        return (v - mu) * lax.rsqrt(var + eps) * g_ref[...] + b_ref[...]

    # ---- K/V projection: once per batch element (qi == 0), persistent --------
    # Requires the qi grid axis to be "arbitrary" (sequential per batch element).
    @pl.when(qi == 0)
    def _():
        kv = jnp.dot(src_kv_ref[0], wkv_ref[...],
                     preferred_element_type=f32) + bkv_ref[...]        # (S, 2D) f32
        kv_scratch[...] = kv.astype(bf16)

    x_q_f32 = src_q_ref[0].astype(f32)                                 # (TQ, D)
    x_q = x_q_f32.astype(bf16)

    # ---- Q projection ---------------------------------------------------------
    q = (jnp.dot(x_q, wq_ref[...], preferred_element_type=f32)
         + bq_ref[...]).astype(bf16)                                   # (TQ, D)

    # ---- multi-head self-attention --------------------------------------------
    # Per-head outputs are folded directly into the output projection, so the
    # only wide write is the lane-dense (TQ, D) accumulator (no sub-128-lane
    # masked stores into a scratch).  The static unroll is chained through
    # `attn`, bounding how many (TQ, S) score tiles are live at once.
    inv_sqrt_dk = np.float32(1.0 / np.sqrt(d_k))
    attn = jnp.zeros((TQ, D), f32)
    for h in range(num_heads):
        lo = h * d_k
        qh = q[:, lo:lo + d_k]                                         # (TQ, d_k)
        kh = kv_scratch[:, lo:lo + d_k]                                # (S,  d_k) bf16
        vh = kv_scratch[:, D + lo:D + lo + d_k]                        # (S,  d_k) bf16
        # contract on the last dim of both operands -> no materialized K.T
        s = lax.dot_general(qh, kh, (((1,), (1,)), ((), ())),
                            preferred_element_type=f32) * inv_sqrt_dk  # (TQ, S)
        s = s - jnp.max(s, axis=-1, keepdims=True)
        e = jnp.exp(s)
        p = e * pl.reciprocal(jnp.sum(e, axis=-1, keepdims=True), approx=True)
        oh = jnp.dot(p.astype(bf16), vh, preferred_element_type=f32)   # (TQ, d_k)
        attn = attn + jnp.dot(oh.astype(bf16), wo_ref[lo:lo + d_k, :],
                              preferred_element_type=f32)              # (TQ, D)
    attn = attn + bo_ref[...]
    # TODO(synk): for long sequences on v7x (64 MiB VMEM), stream K/V tiles with
    # an online softmax (extra kv grid axis / emit_pipeline) instead of keeping
    # the full (S, 2D) K/V scratch and (TQ, S) score tiles resident.
    # TODO(synk): optional src_mask / src_key_padding_mask are not implemented
    # (mask=None path only, matching the default PyTorch call).

    # ---- residual + norm1 (dropout = identity, eval semantics) ----------------
    x = layer_norm(x_q_f32 + attn, g1_ref, be1_ref)

    # ---- feed-forward ----------------------------------------------------------
    h1 = jnp.maximum(jnp.dot(x.astype(bf16), w1_ref[...],
                             preferred_element_type=f32) + b1_ref[...], 0.0)
    ff = jnp.dot(h1.astype(bf16), w2_ref[...],
                 preferred_element_type=f32) + b2_ref[...]

    # ---- residual + norm2 ------------------------------------------------------
    y = layer_norm(x + ff, g2_ref, be2_ref)
    out_ref[0] = y.astype(out_ref.dtype)


# ---------------------------------------------------------------------------
# One-time parameter preparation (feedback: keep concat/casts out of the
# per-call wrapper).
# ---------------------------------------------------------------------------
def prepare_params(params):
    bf16, f32 = jnp.bfloat16, jnp.float32
    return {
        "wq": params["wq"].astype(bf16), "bq": params["bq"].astype(f32),
        "wkv": jnp.concatenate([params["wk"], params["wv"]], axis=1).astype(bf16),
        "bkv": jnp.concatenate([params["bk"], params["bv"]], axis=1).astype(f32),
        "wo": params["wo"].astype(bf16), "bo": params["bo"].astype(f32),
        "w1": params["w1"].astype(bf16), "b1": params["b1"].astype(f32),
        "w2": params["w2"].astype(bf16), "b2": params["b2"].astype(f32),
        "g1": params["g1"].astype(f32), "be1": params["be1"].astype(f32),
        "g2": params["g2"].astype(f32), "be2": params["be2"].astype(f32),
    }


# ---------------------------------------------------------------------------
# Wrapper
# ---------------------------------------------------------------------------
def transformer_encoder_layer(src, prep, *, num_heads, block_q=128):
    """src: (B, S, D) float32.  prep: output of prepare_params()."""
    B, S, D = src.shape
    F_dim = prep["w1"].shape[1]
    assert D % num_heads == 0
    # On v6e/v5e (128 MiB VMEM) sweep block_q=256/512; keep 128-256 on v7x.
    TQ = S if S <= block_q else block_q
    # TODO(synk): ragged / non-divisible sequence lengths need tail masking.
    assert S % TQ == 0, "sequence length must be divisible by the q-tile size"
    n_q = S // TQ

    # K/V source in bf16 (halves the per-batch DMA + VMEM residency); the f32
    # q-tile input is kept for the residual / LayerNorm path.
    src_kv = src.astype(jnp.bfloat16)

    # Grid-invariant params: unblocked, single resident VMEM copy (no pointless
    # double-buffering of the weights).
    wspec = pl.BlockSpec(memory_space=pltpu.MemorySpace.VMEM)
    seq_kv = pl.BlockSpec((1, S, D), lambda b, qi: (b, 0, 0))      # per-batch K/V source
    seq_q = pl.BlockSpec((1, TQ, D), lambda b, qi: (b, qi, 0))     # query tile

    kernel = functools.partial(_encoder_layer_kernel, num_heads=num_heads)

    # ---- VMEM budget: weights + pipeline buffers + persistent scratch +
    # in-kernel temporaries, capped below physical VMEM. ------------------------
    def nb(a):
        return int(a.size) * a.dtype.itemsize
    weight_bytes = sum(nb(prep[k]) for k in
                       ("wq", "bq", "wkv", "bkv", "wo", "bo",
                        "w1", "b1", "w2", "b2", "g1", "be1", "g2", "be2"))
    pipe_bytes = 2 * (S * D * 2 + TQ * D * 4 + TQ * D * src.dtype.itemsize)
    scratch_bytes = S * 2 * D * 2
    tmp_bytes = (S * 2 * D * 4            # f32 K/V projection intermediate (qi==0)
                 + 2 * TQ * S * 4         # live f32 score tiles
                 + TQ * max(F_dim, 2 * D) * 4
                 + 6 * TQ * D * 4)
    est = weight_bytes + pipe_bytes + scratch_bytes + tmp_bytes + (4 << 20)
    try:
        phys_vmem = int(pltpu.get_tpu_info().vmem_capacity_bytes)
    except Exception:
        phys_vmem = 64 * 2**20            # conservative fallback (v7x per-core)
    cap = phys_vmem * 7 // 8              # headroom for Mosaic internal scratch
    # If est > cap at production shapes: reduce block_q / implement K/V streaming.
    vmem_limit = int(min(max(est, 16 * 2**20), cap))

    # Advisory cost for XLA scheduling around the custom call.
    flops = B * (8 * S * D * D + 4 * S * S * D + 4 * S * D * F_dim)
    cost = pl.CostEstimate(
        flops=int(flops),
        transcendentals=int(B * num_heads * S * S),
        bytes_accessed=int(weight_bytes + B * S * D * (2 + 4 + 4)),
    )

    return pl.pallas_call(
        kernel,
        out_shape=jax.ShapeDtypeStruct((B, S, D), src.dtype),
        grid_spec=pltpu.PrefetchScalarGridSpec(
            num_scalar_prefetch=0,
            grid=(B, n_q),
            in_specs=[
                seq_kv, seq_q,
                wspec, wspec,              # wq, bq
                wspec, wspec,              # wkv, bkv
                wspec, wspec,              # wo, bo
                wspec, wspec,              # w1, b1
                wspec, wspec,              # w2, b2
                wspec, wspec, wspec, wspec,  # g1, be1, g2, be2
            ],
            out_specs=seq_q,
            scratch_shapes=[pltpu.VMEM((S, 2 * D), jnp.bfloat16)],
        ),
        compiler_params=pltpu.CompilerParams(
            # batch axis parallel (megacore / 2-TC); q-tile axis must be
            # "arbitrary" so each batch element executes qi == 0 (persistent KV).
            dimension_semantics=("parallel", "arbitrary"),
            vmem_limit_bytes=vmem_limit),
        cost_estimate=cost,
    )(src_kv, src,
      prep["wq"], prep["bq"], prep["wkv"], prep["bkv"], prep["wo"], prep["bo"],
      prep["w1"], prep["b1"], prep["w2"], prep["b2"],
      prep["g1"], prep["be1"], prep["g2"], prep["be2"])


# ---------------------------------------------------------------------------
# Plain-JAX reference (mirrors the PyTorch forward, eval mode, f32)
# ---------------------------------------------------------------------------
def reference(src, p, *, num_heads):
    B, S, D = src.shape
    d_k = D // num_heads

    def lin(x, w, b):
        return x @ w + b

    def ln(x, g, b, eps=1e-5):
        mu = x.mean(-1, keepdims=True)
        var = ((x - mu) ** 2).mean(-1, keepdims=True)
        return (x - mu) / jnp.sqrt(var + eps) * g + b

    q = lin(src, p["wq"], p["bq"]).reshape(B, S, num_heads, d_k).transpose(0, 2, 1, 3)
    k = lin(src, p["wk"], p["bk"]).reshape(B, S, num_heads, d_k).transpose(0, 2, 1, 3)
    v = lin(src, p["wv"], p["bv"]).reshape(B, S, num_heads, d_k).transpose(0, 2, 1, 3)
    scores = jnp.einsum("bhqd,bhkd->bhqk", q, k) / np.sqrt(d_k)
    w = jax.nn.softmax(scores, axis=-1)
    o = jnp.einsum("bhqk,bhkd->bhqd", w, v).transpose(0, 2, 1, 3).reshape(B, S, D)
    o = lin(o, p["wo"], p["bo"])
    x = ln(src + o, p["g1"], p["be1"])
    ff = lin(jnp.maximum(lin(x, p["w1"], p["b1"]), 0.0), p["w2"], p["b2"])
    return ln(x + ff, p["g2"], p["be2"])


# ---------------------------------------------------------------------------
if __name__ == "__main__":
    B, S, D, H, FF = 2, 8, 32, 4, 64

    key = jax.random.PRNGKey(0)
    keys = jax.random.split(key, 16)

    def w(k, shape, scale=0.1):
        return (scale * jax.random.normal(k, shape)).astype(jnp.float32)

    params = {
        # Linear weights already in (in, out) layout (i.e. PyTorch weight.T)
        "wq": w(keys[0], (D, D)),  "bq": w(keys[1], (1, D)),
        "wk": w(keys[2], (D, D)),  "bk": w(keys[3], (1, D)),
        "wv": w(keys[4], (D, D)),  "bv": w(keys[5], (1, D)),
        "wo": w(keys[6], (D, D)),  "bo": w(keys[7], (1, D)),
        "w1": w(keys[8], (D, FF)), "b1": w(keys[9], (1, FF)),
        "w2": w(keys[10], (FF, D)), "b2": w(keys[11], (1, D)),
        "g1": jnp.ones((1, D), jnp.float32),  "be1": jnp.zeros((1, D), jnp.float32),
        "g2": jnp.ones((1, D), jnp.float32),  "be2": jnp.zeros((1, D), jnp.float32),
    }

    src = jax.random.normal(keys[12], (B, S, D), dtype=jnp.float32)

    prep = prepare_params(params)          # one-time weight prep
    out = transformer_encoder_layer(src, prep, num_heads=H)
    out = jax.block_until_ready(out)

    ref = reference(src, params, num_heads=H)
    # bf16 MXU operands / bf16 K-V cache (f32 accumulate) -> relaxed tolerance.
    np.testing.assert_allclose(np.asarray(out), np.asarray(ref), atol=3e-2, rtol=3e-2)

    print("KERNEL_OK")
</pallas_src>

<mosaic_0001>
module attributes {stable_mosaic.version = 11 : i64} {
  func.func @_encoder_layer_kernel(%arg0: i32, %arg1: i32, %arg2: memref<1x8x32xbf16, #tpu.memory_space<vmem>>, %arg3: memref<1x8x32xf32, #tpu.memory_space<vmem>>, %arg4: memref<32x32xbf16, #tpu.memory_space<vmem>>, %arg5: memref<1x32xf32, #tpu.memory_space<vmem>>, %arg6: memref<32x64xbf16, #tpu.memory_space<vmem>>, %arg7: memref<1x64xf32, #tpu.memory_space<vmem>>, %arg8: memref<32x32xbf16, #tpu.memory_space<vmem>>, %arg9: memref<1x32xf32, #tpu.memory_space<vmem>>, %arg10: memref<32x64xbf16, #tpu.memory_space<vmem>>, %arg11: memref<1x64xf32, #tpu.memory_space<vmem>>, %arg12: memref<64x32xbf16, #tpu.memory_space<vmem>>, %arg13: memref<1x32xf32, #tpu.memory_space<vmem>>, %arg14: memref<1x32xf32, #tpu.memory_space<vmem>>, %arg15: memref<1x32xf32, #tpu.memory_space<vmem>>, %arg16: memref<1x32xf32, #tpu.memory_space<vmem>>, %arg17: memref<1x32xf32, #tpu.memory_space<vmem>>, %arg18: memref<1x8x32xf32, #tpu.memory_space<vmem>>, %arg19: memref<8x64xbf16, #tpu.memory_space<vmem>>) attributes {dimension_semantics = [#tpu.dimension_semantics<parallel>, #tpu.dimension_semantics<arbitrary>], iteration_bounds = array<i64: 2, 1>, scalar_prefetch = 0 : i64, scratch_operands = 1 : i64, tpu.core_type = #tpu.core_type<tc>, window_params = [{transform_indices = @transform_0, window_bounds = array<i64: 1, 8, 32>}, {transform_indices = @transform_1, window_bounds = array<i64: 1, 8, 32>}, {pipeline_mode = #tpu.pipeline_mode<synchronous>, transform_indices = @transform_2, window_bounds = array<i64: 32, 32>}, {pipeline_mode = #tpu.pipeline_mode<synchronous>, transform_indices = @transform_3, window_bounds = array<i64: 1, 32>}, {pipeline_mode = #tpu.pipeline_mode<synchronous>, transform_indices = @transform_4, window_bounds = array<i64: 32, 64>}, {pipeline_mode = #tpu.pipeline_mode<synchronous>, transform_indices = @transform_5, window_bounds = array<i64: 1, 64>}, {pipeline_mode = #tpu.pipeline_mode<synchronous>, transform_indices = @transform_6, window_bounds = array<i64: 32, 32>}, {pipeline_mode = #tpu.pipeline_mode<synchronous>, transform_indices = @transform_7, window_bounds = array<i64: 1, 32>}, {pipeline_mode = #tpu.pipeline_mode<synchronous>, transform_indices = @transform_8, window_bounds = array<i64: 32, 64>}, {pipeline_mode = #tpu.pipeline_mode<synchronous>, transform_indices = @transform_9, window_bounds = array<i64: 1, 64>}, {pipeline_mode = #tpu.pipeline_mode<synchronous>, transform_indices = @transform_10, window_bounds = array<i64: 64, 32>}, {pipeline_mode = #tpu.pipeline_mode<synchronous>, transform_indices = @transform_11, window_bounds = array<i64: 1, 32>}, {pipeline_mode = #tpu.pipeline_mode<synchronous>, transform_indices = @transform_12, window_bounds = array<i64: 1, 32>}, {pipeline_mode = #tpu.pipeline_mode<synchronous>, transform_indices = @transform_13, window_bounds = array<i64: 1, 32>}, {pipeline_mode = #tpu.pipeline_mode<synchronous>, transform_indices = @transform_14, window_bounds = array<i64: 1, 32>}, {pipeline_mode = #tpu.pipeline_mode<synchronous>, transform_indices = @transform_15, window_bounds = array<i64: 1, 32>}, {transform_indices = @transform_16, window_bounds = array<i64: 1, 8, 32>}]} {
    %c0_i32 = arith.constant 0 : i32
    %0 = arith.cmpi eq, %arg1, %c0_i32 : i32
    %1 = arith.extui %0 : i1 to i32
    %c0_i32_0 = arith.constant 0 : i32
    %2 = arith.cmpi ne, %1, %c0_i32_0 : i32
    scf.if %2 {
      %c0_83 = arith.constant 0 : index
      %c0_84 = arith.constant 0 : index
      %c0_85 = arith.constant 0 : index
      %171 = vector.load %arg2[%c0_83, %c0_84, %c0_85] : memref<1x8x32xbf16, #tpu.memory_space<vmem>>, vector<1x8x32xbf16>
      %172 = vector.shape_cast %171 : vector<1x8x32xbf16> to vector<8x32xbf16>
      %c0_86 = arith.constant 0 : index
      %c0_87 = arith.constant 0 : index
      %173 = vector.load %arg6[%c0_86, %c0_87] : memref<32x64xbf16, #tpu.memory_space<vmem>>, vector<32x64xbf16>
      %cst_88 = arith.constant dense<0.000000e+00> : vector<8x64xf32>
      %174 = tpu.matmul %172, %173, %cst_88 {dimension_numbers = #tpu.dot_dimension_numbers<[1], [0], [0], [1], [0, 0, 1, 1], [], []>} : vector<8x32xbf16>, vector<32x64xbf16>, vector<8x64xf32> -> vector<8x64xf32>
      %c0_89 = arith.constant 0 : index
      %c0_90 = arith.constant 0 : index
      %175 = vector.load %arg7[%c0_89, %c0_90] : memref<1x64xf32, #tpu.memory_space<vmem>>, vector<1x64xf32>
      %176 = vector.broadcast %175 : vector<1x64xf32> to vector<8x64xf32>
      %177 = arith.addf %174, %176 : vector<8x64xf32>
      %178 = arith.truncf %177 : vector<8x64xf32> to vector<8x64xbf16>
      %c0_91 = arith.constant 0 : index
      %c0_92 = arith.constant 0 : index
      %179 = vector.load %arg19[%c0_91, %c0_92] : memref<8x64xbf16, #tpu.memory_space<vmem>>, vector<8x64xbf16>
      tpu.vector_store %arg19[%c0_91, %c0_92], %178 {strides = array<i32>} : memref<8x64xbf16, #tpu.memory_space<vmem>>, vector<8x64xbf16>,
    } else {
    }
    %c0 = arith.constant 0 : index
    %c0_1 = arith.constant 0 : index
    %c0_2 = arith.constant 0 : index
    %3 = vector.load %arg3[%c0, %c0_1, %c0_2] : memref<1x8x32xf32, #tpu.memory_space<vmem>>, vector<1x8x32xf32>
    %4 = vector.shape_cast %3 : vector<1x8x32xf32> to vector<8x32xf32>
    %5 = arith.truncf %4 : vector<8x32xf32> to vector<8x32xbf16>
    %c0_3 = arith.constant 0 : index
    %c0_4 = arith.constant 0 : index
    %6 = vector.load %arg4[%c0_3, %c0_4] : memref<32x32xbf16, #tpu.memory_space<vmem>>, vector<32x32xbf16>
    %cst = arith.constant dense<0.000000e+00> : vector<8x32xf32>
    %7 = tpu.matmul %5, %6, %cst {dimension_numbers = #tpu.dot_dimension_numbers<[1], [0], [0], [1], [0, 0, 1, 1], [], []>} : vector<8x32xbf16>, vector<32x32xbf16>, vector<8x32xf32> -> vector<8x32xf32>
    %c0_5 = arith.constant 0 : index
    %c0_6 = arith.constant 0 : index
    %8 = vector.load %arg5[%c0_5, %c0_6] : memref<1x32xf32, #tpu.memory_space<vmem>>, vector<1x32xf32>
    %9 = vector.broadcast %8 : vector<1x32xf32> to vector<8x32xf32>
    %10 = arith.addf %7, %9 : vector<8x32xf32>
    %11 = arith.truncf %10 : vector<8x32xf32> to vector<8x32xbf16>
    %cst_7 = arith.constant 0.000000e+00 : f32
    %12 = vector.broadcast %cst_7 : f32 to vector<8x32xf32>
    %13 = vector.extract_strided_slice %11 {offsets = [0, 0], sizes = [8, 8], strides = [1, 1]} : vector<8x32xbf16> to vector<8x8xbf16>
    %c0_8 = arith.constant 0 : index
    %c0_9 = arith.constant 0 : index
    %14 = vector.load %arg19[%c0_8, %c0_9] : memref<8x64xbf16, #tpu.memory_space<vmem>>, vector<8x8xbf16>
    %c0_10 = arith.constant 0 : index
    %c32 = arith.constant 32 : index
    %15 = vector.load %arg19[%c0_10, %c32] : memref<8x64xbf16, #tpu.memory_space<vmem>>, vector<8x8xbf16>
    %cst_11 = arith.constant dense<0.000000e+00> : vector<8x8xf32>
    %16 = tpu.matmul %13, %14, %cst_11 {dimension_numbers = #tpu.dot_dimension_numbers<[1], [1], [0], [0], [0, 0, 1, 0], [], []>} : vector<8x8xbf16>, vector<8x8xbf16>, vector<8x8xf32> -> vector<8x8xf32>
    %cst_12 = arith.constant 0.353553385 : f32
    %17 = vector.broadcast %cst_12 : f32 to vector<8x8xf32>
    %18 = arith.mulf %16, %17 : vector<8x8xf32>
    %cst_13 = arith.constant dense<0xFF800000> : vector<8xf32>
    %19 = vector.multi_reduction <maximumf>, %18, %cst_13 [1] : vector<8x8xf32> to vector<8xf32>
    %20 = vector.shape_cast %19 : vector<8xf32> to vector<8x1xf32>
    %21 = vector.broadcast %20 : vector<8x1xf32> to vector<8x8xf32>
    %22 = arith.subf %18, %21 : vector<8x8xf32>
    %23 = math.exp %22 : vector<8x8xf32>
    %cst_14 = arith.constant dense<0.000000e+00> : vector<8xf32>
    %24 = vector.multi_reduction <add>, %23, %cst_14 [1] : vector<8x8xf32> to vector<8xf32>
    %25 = vector.shape_cast %24 : vector<8xf32> to vector<8x1xf32>
    %26 = tpu.reciprocal %25 {approx = true} : vector<8x1xf32> -> vector<8x1xf32>
    %27 = vector.broadcast %26 : vector<8x1xf32> to vector<8x8xf32>
    %28 = arith.mulf %23, %27 : vector<8x8xf32>
    %29 = arith.truncf %28 : vector<8x8xf32> to vector<8x8xbf16>
    %cst_15 = arith.constant dense<0.000000e+00> : vector<8x8xf32>
    %30 = tpu.matmul %29, %15, %cst_15 {dimension_numbers = #tpu.dot_dimension_numbers<[1], [0], [0], [1], [0, 0, 1, 1], [], []>} : vector<8x8xbf16>, vector<8x8xbf16>, vector<8x8xf32> -> vector<8x8xf32>
    %31 = arith.truncf %30 : vector<8x8xf32> to vector<8x8xbf16>
    %c0_16 = arith.constant 0 : index
    %c0_17 = arith.constant 0 : index
    %32 = vector.load %arg8[%c0_16, %c0_17] : memref<32x32xbf16, #tpu.memory_space<vmem>>, vector<8x32xbf16>
    %cst_18 = arith.constant dense<0.000000e+00> : vector<8x32xf32>
    %33 = tpu.matmul %31, %32, %cst_18 {dimension_numbers = #tpu.dot_dimension_numbers<[1], [0], [0], [1], [0, 0, 1, 1], [], []>} : vector<8x8xbf16>, vector<8x32xbf16>, vector<8x32xf32> -> vector<8x32xf32>
    %34 = arith.addf %12, %33 : vector<8x32xf32>
    %35 = vector.extract_strided_slice %11 {offsets = [0, 8], sizes = [8, 8], strides = [1, 1]} : vector<8x32xbf16> to vector<8x8xbf16>
    %c0_19 = arith.constant 0 : index
    %c8 = arith.constant 8 : index
    %36 = vector.load %arg19[%c0_19, %c8] : memref<8x64xbf16, #tpu.memory_space<vmem>>, vector<8x8xbf16>
    %c0_20 = arith.constant 0 : index
    %c40 = arith.constant 40 : index
    %37 = vector.load %arg19[%c0_20, %c40] : memref<8x64xbf16, #tpu.memory_space<vmem>>, vector<8x8xbf16>
    %cst_21 = arith.constant dense<0.000000e+00> : vector<8x8xf32>
    %38 = tpu.matmul %35, %36, %cst_21 {dimension_numbers = #tpu.dot_dimension_numbers<[1], [1], [0], [0], [0, 0, 1, 0], [], []>} : vector<8x8xbf16>, vector<8x8xbf16>, vector<8x8xf32> -> vector<8x8xf32>
    %cst_22 = arith.constant 0.353553385 : f32
    %39 = vector.broadcast %cst_22 : f32 to vector<8x8xf32>
    %40 = arith.mulf %38, %39 : vector<8x8xf32>
    %cst_23 = arith.constant dense<0xFF800000> : vector<8xf32>
    %41 = vector.multi_reduction <maximumf>, %40, %cst_23 [1] : vector<8x8xf32> to vector<8xf32>
    %42 = vector.shape_cast %41 : vector<8xf32> to vector<8x1xf32>
    %43 = vector.broadcast %42 : vector<8x1xf32> to vector<8x8xf32>
    %44 = arith.subf %40, %43 : vector<8x8xf32>
    %45 = math.exp %44 : vector<8x8xf32>
    %cst_24 = arith.constant dense<0.000000e+00> : vector<8xf32>
    %46 = vector.multi_reduction <add>, %45, %cst_24 [1] : vector<8x8xf32> to vector<8xf32>
    %47 = vector.shape_cast %46 : vector<8xf32> to vector<8x1xf32>
    %48 = tpu.reciprocal %47 {approx = true} : vector<8x1xf32> -> vector<8x1xf32>
    %49 = vector.broadcast %48 : vector<8x1xf32> to vector<8x8xf32>
    %50 = arith.mulf %45, %49 : vector<8x8xf32>
    %51 = arith.truncf %50 : vector<8x8xf32> to vector<8x8xbf16>
    %cst_25 = arith.constant dense<0.000000e+00> : vector<8x8xf32>
    %52 = tpu.matmul %51, %37, %cst_25 {dimension_numbers = #tpu.dot_dimension_numbers<[1], [0], [0], [1], [0, 0, 1, 1], [], []>} : vector<8x8xbf16>, vector<8x8xbf16>, vector<8x8xf32> -> vector<8x8xf32>
    %53 = arith.truncf %52 : vector<8x8xf32> to vector<8x8xbf16>
    %c8_26 = arith.constant 8 : index
    %c0_27 = arith.constant 0 : index
    %54 = vector.load %arg8[%c8_26, %c0_27] : memref<32x32xbf16, #tpu.memory_space<vmem>>, vector<8x32xbf16>
    %cst_28 = arith.constant dense<0.000000e+00> : vector<8x32xf32>
    %55 = tpu.matmul %53, %54, %cst_28 {dimension_numbers = #tpu.dot_dimension_numbers<[1], [0], [0], [1], [0, 0, 1, 1], [], []>} : vector<8x8xbf16>, vector<8x32xbf16>, vector<8x32xf32> -> vector<8x32xf32>
    %56 = arith.addf %34, %55 : vector<8x32xf32>
    %57 = vector.extract_strided_slice %11 {offsets = [0, 16], sizes = [8, 8], strides = [1, 1]} : vector<8x32xbf16> to vector<8x8xbf16>
    %c0_29 = arith.constant 0 : index
    %c16 = arith.constant 16 : index
    %58 = vector.load %arg19[%c0_29, %c16] : memref<8x64xbf16, #tpu.memory_space<vmem>>, vector<8x8xbf16>
    %c0_30 = arith.constant 0 : index
    %c48 = arith.constant 48 : index
    %59 = vector.load %arg19[%c0_30, %c48] : memref<8x64xbf16, #tpu.memory_space<vmem>>, vector<8x8xbf16>
    %cst_31 = arith.constant dense<0.000000e+00> : vector<8x8xf32>
    %60 = tpu.matmul %57, %58, %cst_31 {dimension_numbers = #tpu.dot_dimension_numbers<[1], [1], [0], [0], [0, 0, 1, 0], [], []>} : vector<8x8xbf16>, vector<8x8xbf16>, vector<8x8xf32> -> vector<8x8xf32>
    %cst_32 = arith.constant 0.353553385 : f32
    %61 = vector.broadcast %cst_32 : f32 to vector<8x8xf32>
    %62 = arith.mulf %60, %61 : vector<8x8xf32>
    %cst_33 = arith.constant dense<0xFF800000> : vector<8xf32>
    %63 = vector.multi_reduction <maximumf>, %62, %cst_33 [1] : vector<8x8xf32> to vector<8xf32>
    %64 = vector.shape_cast %63 : vector<8xf32> to vector<8x1xf32>
    %65 = vector.broadcast %64 : vector<8x1xf32> to vector<8x8xf32>
    %66 = arith.subf %62, %65 : vector<8x8xf32>
    %67 = math.exp %66 : vector<8x8xf32>
    %cst_34 = arith.constant dense<0.000000e+00> : vector<8xf32>
    %68 = vector.multi_reduction <add>, %67, %cst_34 [1] : vector<8x8xf32> to vector<8xf32>
    %69 = vector.shape_cast %68 : vector<8xf32> to vector<8x1xf32>
    %70 = tpu.reciprocal %69 {approx = true} : vector<8x1xf32> -> vector<8x1xf32>
    %71 = vector.broadcast %70 : vector<8x1xf32> to vector<8x8xf32>
    %72 = arith.mulf %67, %71 : vector<8x8xf32>
    %73 = arith.truncf %72 : vector<8x8xf32> to vector<8x8xbf16>
    %cst_35 = arith.constant dense<0.000000e+00> : vector<8x8xf32>
    %74 = tpu.matmul %73, %59, %cst_35 {dimension_numbers = #tpu.dot_dimension_numbers<[1], [0], [0], [1], [0, 0, 1, 1], [], []>} : vector<8x8xbf16>, vector<8x8xbf16>, vector<8x8xf32> -> vector<8x8xf32>
    %75 = arith.truncf %74 : vector<8x8xf32> to vector<8x8xbf16>
    %c16_36 = arith.constant 16 : index
    %c0_37 = arith.constant 0 : index
    %76 = vector.load %arg8[%c16_36, %c0_37] : memref<32x32xbf16, #tpu.memory_space<vmem>>, vector<8x32xbf16>
    %cst_38 = arith.constant dense<0.000000e+00> : vector<8x32xf32>
    %77 = tpu.matmul %75, %76, %cst_38 {dimension_numbers = #tpu.dot_dimension_numbers<[1], [0], [0], [1], [0, 0, 1, 1], [], []>} : vector<8x8xbf16>, vector<8x32xbf16>, vector<8x32xf32> -> vector<8x32xf32>
    %78 = arith.addf %56, %77 : vector<8x32xf32>
    %79 = vector.extract_strided_slice %11 {offsets = [0, 24], sizes = [8, 8], strides = [1, 1]} : vector<8x32xbf16> to vector<8x8xbf16>
    %c0_39 = arith.constant 0 : index
    %c24 = arith.constant 24 : index
    %80 = vector.load %arg19[%c0_39, %c24] : memref<8x64xbf16, #tpu.memory_space<vmem>>, vector<8x8xbf16>
    %c0_40 = arith.constant 0 : index
    %c56 = arith.constant 56 : index
    %81 = vector.load %arg19[%c0_40, %c56] : memref<8x64xbf16, #tpu.memory_space<vmem>>, vector<8x8xbf16>
    %cst_41 = arith.constant dense<0.000000e+00> : vector<8x8xf32>
    %82 = tpu.matmul %79, %80, %cst_41 {dimension_numbers = #tpu.dot_dimension_numbers<[1], [1], [0], [0], [0, 0, 1, 0], [], []>} : vector<8x8xbf16>, vector<8x8xbf16>, vector<8x8xf32> -> vector<8x8xf32>
    %cst_42 = arith.constant 0.353553385 : f32
    %83 = vector.broadcast %cst_42 : f32 to vector<8x8xf32>
    %84 = arith.mulf %82, %83 : vector<8x8xf32>
    %cst_43 = arith.constant dense<0xFF800000> : vector<8xf32>
    %85 = vector.multi_reduction <maximumf>, %84, %cst_43 [1] : vector<8x8xf32> to vector<8xf32>
    %86 = vector.shape_cast %85 : vector<8xf32> to vector<8x1xf32>
    %87 = vector.broadcast %86 : vector<8x1xf32> to vector<8x8xf32>
    %88 = arith.subf %84, %87 : vector<8x8xf32>
    %89 = math.exp %88 : vector<8x8xf32>
    %cst_44 = arith.constant dense<0.000000e+00> : vector<8xf32>
    %90 = vector.multi_reduction <add>, %89, %cst_44 [1] : vector<8x8xf32> to vector<8xf32>
    %91 = vector.shape_cast %90 : vector<8xf32> to vector<8x1xf32>
    %92 = tpu.reciprocal %91 {approx = true} : vector<8x1xf32> -> vector<8x1xf32>
    %93 = vector.broadcast %92 : vector<8x1xf32> to vector<8x8xf32>
    %94 = arith.mulf %89, %93 : vector<8x8xf32>
    %95 = arith.truncf %94 : vector<8x8xf32> to vector<8x8xbf16>
    %cst_45 = arith.constant dense<0.000000e+00> : vector<8x8xf32>
    %96 = tpu.matmul %95, %81, %cst_45 {dimension_numbers = #tpu.dot_dimension_numbers<[1], [0], [0], [1], [0, 0, 1, 1], [], []>} : vector<8x8xbf16>, vector<8x8xbf16>, vector<8x8xf32> -> vector<8x8xf32>
    %97 = arith.truncf %96 : vector<8x8xf32> to vector<8x8xbf16>
    %c24_46 = arith.constant 24 : index
    %c0_47 = arith.constant 0 : index
    %98 = vector.load %arg8[%c24_46, %c0_47] : memref<32x32xbf16, #tpu.memory_space<vmem>>, vector<8x32xbf16>
    %cst_48 = arith.constant dense<0.000000e+00> : vector<8x32xf32>
    %99 = tpu.matmul %97, %98, %cst_48 {dimension_numbers = #tpu.dot_dimension_numbers<[1], [0], [0], [1], [0, 0, 1, 1], [], []>} : vector<8x8xbf16>, vector<8x32xbf16>, vector<8x32xf32> -> vector<8x32xf32>
    %100 = arith.addf %78, %99 : vector<8x32xf32>
    %c0_49 = arith.constant 0 : index
    %c0_50 = arith.constant 0 : index
    %101 = vector.load %arg9[%c0_49, %c0_50] : memref<1x32xf32, #tpu.memory_space<vmem>>, vector<1x32xf32>
    %102 = vector.broadcast %101 : vector<1x32xf32> to vector<8x32xf32>
    %103 = arith.addf %100, %102 : vector<8x32xf32>
    %104 = arith.addf %4, %103 : vector<8x32xf32>
    %cst_51 = arith.constant dense<0.000000e+00> : vector<8xf32>
    %105 = vector.multi_reduction <add>, %104, %cst_51 [1] : vector<8x32xf32> to vector<8xf32>
    %106 = vector.shape_cast %105 : vector<8xf32> to vector<8x1xf32>
    %cst_52 = arith.constant 3.200000e+01 : f32
    %107 = vector.broadcast %cst_52 : f32 to vector<8x1xf32>
    %108 = arith.divf %106, %107 : vector<8x1xf32>
    %109 = vector.broadcast %108 : vector<8x1xf32> to vector<8x32xf32>
    %110 = arith.subf %104, %109 : vector<8x32xf32>
    %111 = arith.mulf %110, %110 : vector<8x32xf32>
    %cst_53 = arith.constant dense<0.000000e+00> : vector<8xf32>
    %112 = vector.multi_reduction <add>, %111, %cst_53 [1] : vector<8x32xf32> to vector<8xf32>
    %113 = vector.shape_cast %112 : vector<8xf32> to vector<8x1xf32>
    %cst_54 = arith.constant 3.200000e+01 : f32
    %114 = vector.broadcast %cst_54 : f32 to vector<8x1xf32>
    %115 = arith.divf %113, %114 : vector<8x1xf32>
    %116 = vector.broadcast %108 : vector<8x1xf32> to vector<8x32xf32>
    %117 = arith.subf %104, %116 : vector<8x32xf32>
    %cst_55 = arith.constant 9.99999974E-6 : f32
    %118 = vector.broadcast %cst_55 : f32 to vector<8x1xf32>
    %119 = arith.addf %115, %118 : vector<8x1xf32>
    %120 = math.rsqrt %119 : vector<8x1xf32>
    %121 = vector.broadcast %120 : vector<8x1xf32> to vector<8x32xf32>
    %122 = arith.mulf %117, %121 : vector<8x32xf32>
    %c0_56 = arith.constant 0 : index
    %c0_57 = arith.constant 0 : index
    %123 = vector.load %arg14[%c0_56, %c0_57] : memref<1x32xf32, #tpu.memory_space<vmem>>, vector<1x32xf32>
    %124 = vector.broadcast %123 : vector<1x32xf32> to vector<8x32xf32>
    %125 = arith.mulf %122, %124 : vector<8x32xf32>
    %c0_58 = arith.constant 0 : index
    %c0_59 = arith.constant 0 : index
    %126 = vector.load %arg15[%c0_58, %c0_59] : memref<1x32xf32, #tpu.memory_space<vmem>>, vector<1x32xf32>
    %127 = vector.broadcast %126 : vector<1x32xf32> to vector<8x32xf32>
    %128 = arith.addf %125, %127 : vector<8x32xf32>
    %129 = arith.truncf %128 : vector<8x32xf32> to vector<8x32xbf16>
    %c0_60 = arith.constant 0 : index
    %c0_61 = arith.constant 0 : index
    %130 = vector.load %arg10[%c0_60, %c0_61] : memref<32x64xbf16, #tpu.memory_space<vmem>>, vector<32x64xbf16>
    %cst_62 = arith.constant dense<0.000000e+00> : vector<8x64xf32>
    %131 = tpu.matmul %129, %130, %cst_62 {dimension_numbers = #tpu.dot_dimension_numbers<[1], [0], [0], [1], [0, 0, 1, 1], [], []>} : vector<8x32xbf16>, vector<32x64xbf16>, vector<8x64xf32> -> vector<8x64xf32>
    %c0_63 = arith.constant 0 : index
    %c0_64 = arith.constant 0 : index
    %132 = vector.load %arg11[%c0_63, %c0_64] : memref<1x64xf32, #tpu.memory_space<vmem>>, vector<1x64xf32>
    %133 = vector.broadcast %132 : vector<1x64xf32> to vector<8x64xf32>
    %134 = arith.addf %131, %133 : vector<8x64xf32>
    %cst_65 = arith.constant 0.000000e+00 : f32
    %135 = vector.broadcast %cst_65 : f32 to vector<8x64xf32>
    %136 = arith.maximumf %134, %135 : vector<8x64xf32>
    %137 = arith.truncf %136 : vector<8x64xf32> to vector<8x64xbf16>
    %c0_66 = arith.constant 0 : index
    %c0_67 = arith.constant 0 : index
    %138 = vector.load %arg12[%c0_66, %c0_67] : memref<64x32xbf16, #tpu.memory_space<vmem>>, vector<64x32xbf16>
    %cst_68 = arith.constant dense<0.000000e+00> : vector<8x32xf32>
    %139 = tpu.matmul %137, %138, %cst_68 {dimension_numbers = #tpu.dot_dimension_numbers<[1], [0], [0], [1], [0, 0, 1, 1], [], []>} : vector<8x64xbf16>, vector<64x32xbf16>, vector<8x32xf32> -> vector<8x32xf32>
    %c0_69 = arith.constant 0 : index
    %c0_70 = arith.constant 0 : index
    %140 = vector.load %arg13[%c0_69, %c0_70] : memref<1x32xf32, #tpu.memory_space<vmem>>, vector<1x32xf32>
    %141 = vector.broadcast %140 : vector<1x32xf32> to vector<8x32xf32>
    %142 = arith.addf %139, %141 : vector<8x32xf32>
    %143 = arith.addf %128, %142 : vector<8x32xf32>
    %cst_71 = arith.constant dense<0.000000e+00> : vector<8xf32>
    %144 = vector.multi_reduction <add>, %143, %cst_71 [1] : vector<8x32xf32> to vector<8xf32>
    %145 = vector.shape_cast %144 : vector<8xf32> to vector<8x1xf32>
    %cst_72 = arith.constant 3.200000e+01 : f32
    %146 = vector.broadcast %cst_72 : f32 to vector<8x1xf32>
    %147 = arith.divf %145, %146 : vector<8x1xf32>
    %148 = vector.broadcast %147 : vector<8x1xf32> to vector<8x32xf32>
    %149 = arith.subf %143, %148 : vector<8x32xf32>
    %150 = arith.mulf %149, %149 : vector<8x32xf32>
    %cst_73 = arith.constant dense<0.000000e+00> : vector<8xf32>
    %151 = vector.multi_reduction <add>, %150, %cst_73 [1] : vector<8x32xf32> to vector<8xf32>
    %152 = vector.shape_cast %151 : vector<8xf32> to vector<8x1xf32>
    %cst_74 = arith.constant 3.200000e+01 : f32
    %153 = vector.broadcast %cst_74 : f32 to vector<8x1xf32>
    %154 = arith.divf %152, %153 : vector<8x1xf32>
    %155 = vector.broadcast %147 : vector<8x1xf32> to vector<8x32xf32>
    %156 = arith.subf %143, %155 : vector<8x32xf32>
    %cst_75 = arith.constant 9.99999974E-6 : f32
    %157 = vector.broadcast %cst_75 : f32 to vector<8x1xf32>
    %158 = arith.addf %154, %157 : vector<8x1xf32>
    %159 = math.rsqrt %158 : vector<8x1xf32>
    %160 = vector.broadcast %159 : vector<8x1xf32> to vector<8x32xf32>
    %161 = arith.mulf %156, %160 : vector<8x32xf32>
    %c0_76 = arith.constant 0 : index
    %c0_77 = arith.constant 0 : index
    %162 = vector.load %arg16[%c0_76, %c0_77] : memref<1x32xf32, #tpu.memory_space<vmem>>, vector<1x32xf32>
    %163 = vector.broadcast %162 : vector<1x32xf32> to vector<8x32xf32>
    %164 = arith.mulf %161, %163 : vector<8x32xf32>
    %c0_78 = arith.constant 0 : index
    %c0_79 = arith.constant 0 : index
    %165 = vector.load %arg17[%c0_78, %c0_79] : memref<1x32xf32, #tpu.memory_space<vmem>>, vector<1x32xf32>
    %166 = vector.broadcast %165 : vector<1x32xf32> to vector<8x32xf32>
    %167 = arith.addf %164, %166 : vector<8x32xf32>
    %c0_80 = arith.constant 0 : index
    %c0_81 = arith.constant 0 : index
    %c0_82 = arith.constant 0 : index
    %168 = vector.load %arg18[%c0_80, %c0_81, %c0_82] : memref<1x8x32xf32, #tpu.memory_space<vmem>>, vector<1x8x32xf32>
    %169 = vector.shape_cast %168 : vector<1x8x32xf32> to vector<8x32xf32>
    %170 = vector.shape_cast %167 : vector<8x32xf32> to vector<1x8x32xf32>
    tpu.vector_store %arg18[%c0_80, %c0_81, %c0_82], %170 {strides = array<i32>} : memref<1x8x32xf32, #tpu.memory_space<vmem>>, vector<1x8x32xf32>,
    return
  }
  func.func @transform_0(%arg0: i32, %arg1: i32) -> (i32, i32, i32) {
    %c0_i32 = arith.constant 0 : i32
    %c0_i32_0 = arith.constant 0 : i32
    %c0_i32_1 = arith.constant 0 : i32
    return %arg0, %c0_i32, %c0_i32_0 : i32, i32, i32
  }
  func.func @transform_1(%arg0: i32, %arg1: i32) -> (i32, i32, i32) {
    %c0_i32 = arith.constant 0 : i32
    %c0_i32_0 = arith.constant 0 : i32
    return %arg0, %arg1, %c0_i32 : i32, i32, i32
  }
  func.func @transform_2(%arg0: i32, %arg1: i32) -> (i32, i32) {
    %c0_i32 = arith.constant 0 : i32
    %c0_i32_0 = arith.constant 0 : i32
    %c0_i32_1 = arith.constant 0 : i32
    return %c0_i32, %c0_i32_0 : i32, i32
  }
  func.func @transform_3(%arg0: i32, %arg1: i32) -> (i32, i32) {
    %c0_i32 = arith.constant 0 : i32
    %c0_i32_0 = arith.constant 0 : i32
    %c0_i32_1 = arith.constant 0 : i32
    return %c0_i32, %c0_i32_0 : i32, i32
  }
  func.func @transform_4(%arg0: i32, %arg1: i32) -> (i32, i32) {
    %c0_i32 = arith.constant 0 : i32
    %c0_i32_0 = arith.constant 0 : i32
    %c0_i32_1 = arith.constant 0 : i32
    return %c0_i32, %c0_i32_0 : i32, i32
  }
  func.func @transform_5(%arg0: i32, %arg1: i32) -> (i32, i32) {
    %c0_i32 = arith.constant 0 : i32
    %c0_i32_0 = arith.constant 0 : i32
    %c0_i32_1 = arith.constant 0 : i32
    return %c0_i32, %c0_i32_0 : i32, i32
  }
  func.func @transform_6(%arg0: i32, %arg1: i32) -> (i32, i32) {
    %c0_i32 = arith.constant 0 : i32
    %c0_i32_0 = arith.constant 0 : i32
    %c0_i32_1 = arith.constant 0 : i32
    return %c0_i32, %c0_i32_0 : i32, i32
  }
  func.func @transform_7(%arg0: i32, %arg1: i32) -> (i32, i32) {
    %c0_i32 = arith.constant 0 : i32
    %c0_i32_0 = arith.constant 0 : i32
    %c0_i32_1 = arith.constant 0 : i32
    return %c0_i32, %c0_i32_0 : i32, i32
  }
  func.func @transform_8(%arg0: i32, %arg1: i32) -> (i32, i32) {
    %c0_i32 = arith.constant 0 : i32
    %c0_i32_0 = arith.constant 0 : i32
    %c0_i32_1 = arith.constant 0 : i32
    return %c0_i32, %c0_i32_0 : i32, i32
  }
  func.func @transform_9(%arg0: i32, %arg1: i32) -> (i32, i32) {
    %c0_i32 = arith.constant 0 : i32
    %c0_i32_0 = arith.constant 0 : i32
    %c0_i32_1 = arith.constant 0 : i32
    return %c0_i32, %c0_i32_0 : i32, i32
  }
  func.func @transform_10(%arg0: i32, %arg1: i32) -> (i32, i32) {
    %c0_i32 = arith.constant 0 : i32
    %c0_i32_0 = arith.constant 0 : i32
    %c0_i32_1 = arith.constant 0 : i32
    return %c0_i32, %c0_i32_0 : i32, i32
  }
  func.func @transform_11(%arg0: i32, %arg1: i32) -> (i32, i32) {
    %c0_i32 = arith.constant 0 : i32
    %c0_i32_0 = arith.constant 0 : i32
    %c0_i32_1 = arith.constant 0 : i32
    return %c0_i32, %c0_i32_0 : i32, i32
  }
  func.func @transform_12(%arg0: i32, %arg1: i32) -> (i32, i32) {
    %c0_i32 = arith.constant 0 : i32
    %c0_i32_0 = arith.constant 0 : i32
    %c0_i32_1 = arith.constant 0 : i32
    return %c0_i32, %c0_i32_0 : i32, i32
  }
  func.func @transform_13(%arg0: i32, %arg1: i32) -> (i32, i32) {
    %c0_i32 = arith.constant 0 : i32
    %c0_i32_0 = arith.constant 0 : i32
    %c0_i32_1 = arith.constant 0 : i32
    return %c0_i32, %c0_i32_0 : i32, i32
  }
  func.func @transform_14(%arg0: i32, %arg1: i32) -> (i32, i32) {
    %c0_i32 = arith.constant 0 : i32
    %c0_i32_0 = arith.constant 0 : i32
    %c0_i32_1 = arith.constant 0 : i32
    return %c0_i32, %c0_i32_0 : i32, i32
  }
  func.func @transform_15(%arg0: i32, %arg1: i32) -> (i32, i32) {
    %c0_i32 = arith.constant 0 : i32
    %c0_i32_0 = arith.constant 0 : i32
    %c0_i32_1 = arith.constant 0 : i32
    return %c0_i32, %c0_i32_0 : i32, i32
  }
  func.func @transform_16(%arg0: i32, %arg1: i32) -> (i32, i32, i32) {
    %c0_i32 = arith.constant 0 : i32
    %c0_i32_0 = arith.constant 0 : i32
    return %arg0, %arg1, %c0_i32 : i32, i32, i32
  }
}

</mosaic_0001>

<bundles_post_ra>
// kernel: tpu_custom_call.1
= control target key start
LH: loop header
LB: loop body
LE: loop exit
PB: predicated region body
PF: predicated region fallthrough
CT: control target
= control target key end

     0   :  { %s2829_s0 = inlined_call_operand.hbm [shape: bf16[2,8,32], index: 0, kind: input, shape index: {}]   ;;  %s2830_s1 = inlined_call_operand.vmem [shape: f32[2,8,32], index: 1, kind: input, shape index: {}]   ;;  %s2831_s2 = inlined_call_operand.vmem [shape: bf16[32,32], index: 2, kind: input, shape index: {}]   ;;  %s2832_s3 = inlined_call_operand.vmem [shape: f32[1,32], index: 3, kind: input, shape index: {}]   ;;  %s2833_s4 = inlined_call_operand.vmem [shape: bf16[32,64], index: 4, kind: input, shape index: {}]   ;;  %s2834_s5 = inlined_call_operand.vmem [shape: f32[1,64], index: 5, kind: input, shape index: {}]   ;;  %s2835_s6 = inlined_call_operand.hbm [shape: bf16[32,32], index: 6, kind: input, shape index: {}]   ;;  %s2836_s7 = inlined_call_operand.hbm [shape: f32[1,32], index: 7, kind: input, shape index: {}]   ;;  %s2837_s8 = inlined_call_operand.hbm [shape: bf16[32,64], index: 8, kind: input, shape index: {}]   ;;  %s2838_s9 = inlined_call_operand.hbm [shape: f32[1,64], index: 9, kind: input, shape index: {}]   ;;  %s2839_s10 = inlined_call_operand.vmem [shape: bf16[64,32], index: 10, kind: input, shape index: {}]   ;;  %s2840_s11 = inlined_call_operand.vmem [shape: f32[1,32], index: 11, kind: input, shape index: {}]   ;;  %s2841_s12 = inlined_call_operand.vmem [shape: f32[1,32], index: 12, kind: input, shape index: {}]   ;;  %s2842_s13 = inlined_call_operand.vmem [shape: f32[1,32], index: 13, kind: input, shape index: {}]   ;;  %s2843_s14 = inlined_call_operand.vmem [shape: f32[1,32], index: 14, kind: input, shape index: {}]   ;;  %s2844_s15 = inlined_call_operand.vmem [shape: f32[1,32], index: 15, kind: input, shape index: {}]   ;;  %s2845_s16 = inlined_call_operand.hbm [shape: f32[2,8,32], index: 16, kind: output, shape index: {}]  }
   0x1   :  { %2853 = sst [smem:[#allocation22_spill]] %s2829_s0 }
   0x2   :  { %2854 = sst [smem:[#allocation23_spill]] %s2835_s6 }
   0x3   :  { %2855 = sst [smem:[#allocation24_spill]] %s2836_s7 }
   0x4   :  { %2856 = sst [smem:[#allocation25_spill]] %s2837_s8 }
   0x5   :  { %2857 = sst [smem:[#allocation26_spill]] %s2838_s9 }
   0x6   :  { %2858 = sst [smem:[#allocation27_spill]] %s2840_s11 }
   0x7   :  { %2859 = sst [smem:[#allocation28_spill]] %s2843_s14 }
   0x8   :  { %2860 = sst [smem:[#allocation29_spill]] %s2844_s15 }
   0x9   :  { %2861 = sst [smem:[#allocation30_spill]] %s2845_s16 }
   0xa   :  { %21 = vsyncpa [#allocation4], 0 }
   0xb   :  { %23 = vsyncpa [#allocation4 + $0x1], 0 }
   0xc   :  { %24 = vsyncpa [#allocation7], 0 }
   0xd   :  { %25 = vsyncpa [#allocation10], 0 }
   0xe   :  { %26 = vsyncpa [#allocation5], 0 }
   0xf   :  { %28 = vsyncpa [#allocation5 + $0x1], 0  ;;  %s2462_s21 = smov 0   ;;  %s2464_s22 = smov 0  }
  0x10   :  { %s2466_s23 = smov 0   ;;  %s2468_s24 = smov 0  }
  0x11   :  { %s2470_s25 = smov 0   ;;  %s2472_s26 = smov 0  }
  0x12 LB: > { %2862 = sst [smem:[#allocation17_spill]] %s2338_s21  ;;  %s2846_s27 = sadd.s32 4294967295, %s2358_s26   ;;  %s2358_s26 = sphi %s2472_s26, %s34_s26   ;;  %s2354_s25 = sphi %s2470_s25, %s2892_s25   ;;  %s2350_s24 = sphi %s2468_s24, %s2891_s24   ;;  %s2346_s23 = sphi %s2466_s23, %s2895_s23   ;;  %s2342_s22 = sphi %s2464_s22, %s2894_s22   ;;  %s2338_s21 = sphi %s2462_s21, %s2893_s21  }
  0x13   : > { %2863 = sst [smem:[#allocation18_spill]] %s2354_s25  ;;  %p1791_p0 = scmp.ge.s32.totalorder %s2358_s26, 1 }
  0x14   : > { %p2496_p1 = scmp.eq.s32.totalorder %s2846_s27, 0  ;;  %p427_p2 = scmp.lt.s32.totalorder %s2358_s26, 3 }
  0x15   : > { %s2360_s30 = smov [#allocation6]   ;;  %s2361_s18 = smov [#allocation9]  }
  0x16   : > { %p2501_p3 = pnand %p1791_p0, %p427_p2  ;;  %s451_s0 = sshll.u32 %s2360_s30, 4  ;;  %s452_s0 = int_to_ptr.vmem [resolvable:$true] %s451_s0 }
  0x17   : > { %s475_s19 = sshll.u32 %s2361_s18, 4  ;;  %s2362_s20 = smov [#allocation8]   ;;  %s476_s19 = int_to_ptr.vmem [resolvable:$true] %s475_s19 }
  0x18   : > { %p2013_p4 = pneg %p2501_p3  ;;  %s465_s27 = sshll.u32 %s2362_s20, 4  ;;  %s466_s27 = int_to_ptr.vmem [resolvable:$true] %s465_s27 }
  0x19   : > { %s2149_s16 = scalar_lea.vmem %s452_s0, 256  ;;  %p2157_p11 = scmp.lt.s32.totalorder %s452_s0, %s452_s0 }
  0x1a   : > { %p2510_p6 = pnand %p2013_p4, %p2496_p1  ;;  %p2150_p8 = scmp.ne.s32.totalorder %s452_s0, %s2149_s16 }
  0x1b   : > { %p2158_p12 = scmp.lt.s32.totalorder %s2149_s16, %s2149_s16 }
  0x1c   : > { %p2140_p7 = pneg %p2510_p6 }
  0x1d   : > { %p2159_p13 = por %p2158_p12, %p2157_p11 }
  0x1e   : > { %p2152_p9 = pnand %p2150_p8, %p2140_p7 }
  0x20   : > { %p2153_p10 = pneg %p2152_p9 }
  0x22   : > { %p2160_p0 = pnand %p2159_p13, %p2153_p10 }
  0x24   : > { %2163 = shalt.err (!%p2160_p0)
}
  0x25   : > { %s2363_s30 = smov 64   ;;  %s2364_s18 = smov 4  }
  0x26   : > { %s2867_s6 = sld [smem:[#allocation23_spill]]  ;;  %s2175_s14 = scalar_lea.vmem %s476_s19, 256 }
  0x27   : > { %p2176_p2 = scmp.ne.s32.totalorder %s476_s19, %s2175_s14  ;;  %p2183_p9 = scmp.lt.s32.totalorder %s476_s19, %s476_s19 }
  0x28   : > { %p2184_p5 = scmp.lt.s32.totalorder %s2175_s14, %s2175_s14 }
  0x29   : > { %p2178_p4 = pnand %p2176_p2, %p2140_p7 }
  0x2a   : > { %p2185_p11 = por %p2184_p5, %p2183_p9 }
  0x2b   : > { %p2179_p8 = pneg %p2178_p4 }
  0x2c   : > { %2016 = dma.hbm_to_vmem [thread:$0]  (!%p2510_p6), %s2867_s6, 256, %s452_s0, [#allocation7], %s2363_s30, %s2363_s30, %s2364_s18  }
  0x2d   : > { %p2186_p10 = pnand %p2185_p11, %p2179_p8 }
  0x2f   : > { %2189 = shalt.err (!%p2186_p10)
}
  0x30   : > { %s2868_s8 = sld [smem:[#allocation25_spill]]  ;;  %s2201_s15 = scalar_lea.vmem %s466_s27, 16 }
  0x31   : > { %p2202_p12 = scmp.ne.s32.totalorder %s466_s27, %s2201_s15  ;;  %s2208_s0 = scalar_lea.vmem %s466_s27, 32 }
  0x32   : > { %p2209_p2 = scmp.lt.s32.totalorder %s466_s27, %s466_s27  ;;  %p2210_p4 = scmp.lt.s32.totalorder %s2208_s0, %s2201_s15 }
  0x33   : > { %p2204_p13 = pnand %p2202_p12, %p2140_p7 }
  0x34   : > { %p2211_p5 = por %p2210_p4, %p2209_p2 }
  0x35   : > { %p2205_p0 = pneg %p2204_p13 }
  0x36   : > { %2022 = dma.hbm_to_vmem [thread:$0]  (!%p2510_p6), %s2868_s8, 256, %s476_s19, [#allocation10], %s2363_s30, %s2363_s30, %s2364_s18  }
  0x37   : > { %p2212_p8 = pnand %p2211_p5, %p2205_p0 }
  0x39   : > { %2215 = shalt.err (!%p2212_p8)
}
  0x3a   : > { %s2869_s7 = sld [smem:[#allocation24_spill]]  ;;  %s2365_s11 = smov [#allocation11]  }
  0x3b   : > { %s489_s19 = sshll.u32 %s2365_s11, 4  ;;  %s490_s19 = int_to_ptr.vmem [resolvable:$true] %s489_s19 }
  0x3c   : > { %s2227_s30 = scalar_lea.vmem %s490_s19, 16  ;;  %s2234_s18 = scalar_lea.vmem %s490_s19, 32 }
  0x3d   : > { %p2228_p9 = scmp.ne.s32.totalorder %s490_s19, %s2227_s30  ;;  %p2235_p12 = scmp.lt.s32.totalorder %s490_s19, %s490_s19 }
  0x3e   : > { %p2236_p13 = scmp.lt.s32.totalorder %s2234_s18, %s2227_s30 }
  0x3f   : > { %p2230_p11 = pnand %p2228_p9, %p2140_p7 }
  0x40   : > { %2019 = dma.hbm_to_vmem [thread:$0]  (!%p2510_p6), %s2869_s7, 16, %s466_s27, [#allocation7]  }
  0x41   : > { %p2231_p10 = pneg %p2230_p11  ;;  %p2237_p0 = por %p2236_p13, %p2235_p12 }
  0x43   : > { %p2238_p2 = pnand %p2237_p0, %p2231_p10 }
  0x45   : > { %2241 = shalt.err (!%p2238_p2)
}
  0x46   : > { %s2870_s9 = sld [smem:[#allocation26_spill]]  ;;  %s1790_s27 = sadd.s32 4294967294, %s2358_s26  }
  0x47   : > { %s46_s0 = sadd.s32 1, %s2354_s25  ;;  %s53_s17 = sadd.s32 1, %s2346_s23 }
  0x48   : > { %p48_p7 = scmp.ge.s32.totalorder %s46_s0, 2  ;;  %p60_p4 = scmp.ne.s32.totalorder %s2346_s23, %s2342_s22 }
  0x49   : > { %p61_p5 = scmp.eq.s32.totalorder %s2358_s26, 0  ;;  %p66_p9 = scmp.ne.s32.totalorder %s2342_s22, %s2338_s21 }
  0x4a   : > { %s2897_s0 = smov (%p48_p7, %s46_s0), 0  ;;  %s2873_s11 = sadd.s32 4294967295, %s2358_s26  }
  0x4b   : > { %2871 = sst [smem:[#allocation19_spill]] %s2897_s0  ;;  %p2556_p8 = por %p61_p5, %p60_p4 }
  0x4c   : > { %2025 = dma.hbm_to_vmem [thread:$0]  (!%p2510_p6), %s2870_s9, 16, %s490_s19, [#allocation10]  }
  0x4d   : > { %s50_s20 = ssub.s32 %s2354_s25, %s2897_s0  ;;  %p414_p6 = scmp.eq.s32.totalorder %s2873_s11, 1 }
  0x4e   : > { %p51_p11 = scmp.eq.s32.totalorder %s50_s20, 0  ;;  %p2568_p10 = por %p2496_p1, %p66_p9 }
  0x4f   : > { %p2572_p12 = por %p414_p6, %p60_p4  ;;  %p420_p13 = scmp.eq.s32.totalorder %s1790_s27, 1 }
  0x50   : > { %s2577_s18 = scalar_select %p51_p11, %s2346_s23, %s53_s17  }
  0x51   : > { %s2875_s30 = scalar_select %p2572_p12, 1, 0 }
  0x52   : > { %2877 = sst [smem:[#allocation21_spill]] %s2577_s18  ;;  %p2579_p0 = por %p420_p13, %p66_p9 }
  0x53   : > { %2876 = sst [smem:[#allocation20_spill]] %s2875_s30  ;;  %p2038_p2 = scmp.lt.s32.totalorder %s2358_s26, 2 }
  0x54   : > { %s2878_s16 = scalar_select %p2579_p0, 1, 0 }
  0x55   : > { %s518_s15 = sand.u32 1, %s2346_s23   ;;  %s1798_s11 = sshll.u32 %s2354_s25, 6 }
  0x56   : > { %s1797_s20 = sshll.u32 %s518_s15, 2  ;;  %s2879_s8 = sld [smem:[#allocation22_spill]] }
  0x57   : > { %s522_s0 = scalar_lea.vmem [#allocation3], %s1797_s20  ;;  %p2591_p7 = pnand %p2038_p2, %p2556_p8 }
  0x58   : > { %s529_s21 = sshll.u32 %s522_s0, 4  ;;  %s519_s27 = scalar_lea.sflag [#allocation4], %s518_s15  ;;  %s530_s21 = int_to_ptr.vmem [resolvable:$true] %s529_s21 }
  0x59   : > { %p2244_p4 = pneg %p2591_p7  ;;  %s2255_s17 = scalar_lea.vmem %s530_s21, 64 }
  0x5a   : > { %p2256_p5 = scmp.ne.s32.totalorder %s530_s21, %s2255_s17  ;;  %s2366_s25 = smov [#allocation3]  }
  0x5b   : > { %s2260_s18 = sshll.u32 %s2366_s25, 4  ;;  %s2261_s18 = int_to_ptr.vmem [resolvable:$false] %s2260_s18 }
  0x5c   : > { %s527_s9 = scalar_lea.hbm %s2879_s8, %s1798_s11  ;;  %p2258_p9 = pnand %p2256_p5, %p2244_p4 }
  0x5d   : > { %s2262_s6 = scalar_lea.vmem %s2261_s18, 128  ;;  %p2263_p11 = scmp.lt.s32.totalorder %s530_s21, %s2261_s18 }
  0x5e   : > { %p2259_p6 = pneg %p2258_p9  ;;  %p2264_p13 = scmp.lt.s32.totalorder %s2262_s6, %s2255_s17 }
  0x60   : > { %p2265_p0 = por %p2264_p13, %p2263_p11 }
  0x62   : > { %p2266_p8 = pnand %p2265_p0, %p2259_p6 }
  0x64   : > { %2269 = shalt.err (!%p2266_p8)
}
  0x65   : > { %2029 = dma.hbm_to_vmem [thread:$0]  (!%p2591_p7), %s527_s9, 64, %s530_s21, %s519_s27  }
  0x66   : > { %548 = sbr.rel (%p2501_p3) target bundleno = 3611 (0xe1b), region = 84  ;;  %s2602_s7 = sand.u32 (!%p2501_p3), 1, %s2342_s22  }
  0x67   : > { %s1800_s8 = sshll.u32 (!%p2501_p3), %s2602_s7, 2  ;;  %s551_s25 = scalar_lea.sflag (!%p2501_p3), [#allocation4], %s2602_s7 }
  0x68   : > { %s554_s0 = scalar_lea.vmem (!%p2501_p3), [#allocation3], %s1800_s8 }
  0x6b   : > { %2321 = dma.done.wait (%p2568_p10), %s551_s25, 64  }
  0x6c   : > { %2323 = vsyncadd (%p2568_p10), %s551_s25, 4294967232 }
  0x6d   : > { %2325 = dma.done.wait (%p2496_p1), [#allocation7], 272  }
  0x6e   : > { %2327 = vsyncadd (%p2496_p1), [#allocation7], 4294967024 }
  0x6f   : > { %2329 = dma.done.wait (%p2496_p1), [#allocation10], 272  }
  0x70   : > { %2331 = vsyncadd (%p2496_p1), [#allocation10], 4294967024  ;;  %p626_p3 = scmp.lt.s32.totalorder %s2350_s24, 1  ;;  %v2367_v0 = vmov 0.0   ;;  %vm2368_vm0 = vmmov 0   ;;  %v2107_v1 = vld [vmem:[%s2833_s4 + $0x8] sm:$0xff]  }
  0x71   : > { %1885 = vmatprep.subr.bf16.mxu0 %v2367_v0  ;;  %1889 = vmatprep.mubr.msk.bf16.mxu0 %vm2368_vm0, %v2367_v0  ;;  %v2108_v2 = vld [vmem:[%s2833_s4] sm:$0xff]   ;;  %v2109_v3 = vld [vmem:[%s2831_s2 + $0x8] sm:$0xff]   ;;  %vm662_vm1 = vcmask 261120   ;;  %vm707_vm2 = vcmask 519168   ;;  %vm780_vm3 = vcmask 64512   ;;  %vm848_vm4 = vcmask 1043456  }
  0x72   : > { %1893 = vmatprep.subr.bf16.mxu1 %v2367_v0  ;;  %1897 = vmatprep.mubr.msk.bf16.mxu1 %vm2368_vm0, %v2367_v0  ;;  %s627_s9 = scalar_select %p626_p3, %s2350_s24, 1  ;;  %v638_v4 = vld [vmem:[%s554_s0] sm:$0xf]  ;;  %v1807_v8 = vld [vmem:[%s2834_s5] ss:$0 sm:$0xff]  ;;  %vm1567_vm5 = vcmask 523264  }
  0x73   : > { %1886 = vmatpush3.bf16.msra.mxu0 %v2107_v1  ;;  %v2110_v5 = vld [vmem:[%s2831_s2] sm:$0xff]   ;;  %1894 = vmatpush3.bf16.msra.mxu1 %v2109_v3  ;;  %s2371_s29 = smov 88   ;;  %s2372_s28 = smov 112   ;;  %v1007_v56 = vld [vmem:[#allocation6 + $0x4] sm:$0xf] }
  0x74   : > { %s1806_s21 = sshll.u32 %s627_s9, 3  ;;  %1887 = vmatprep.subr.bf16.mxu0 %v2367_v0  ;;  %1895 = vmatprep.subr.bf16.mxu1 %v2367_v0  ;;  %v1811_v19 = vld [vmem:[%s2832_s3] ss:$0 sm:$0xff]  ;;  %s2369_s9 = smov 120   ;;  %v1012_v57 = vsel %vm848_vm4, %v1007_v56, 0 }
  0x75   : > { %s632_s30 = scalar_lea.vmem %s2830_s1, %s1806_s21  ;;  %s2370_s21 = smov 96   ;;  %v893_v62 = vld [vmem:[#allocation6] sm:$0xf] }
  0x76   : > { %v2642_v6 = vld [vmem:[%s632_s30] sm:$0xff]  ;;  %s2373_s14 = smov 80   ;;  %s2374_s19 = smov 104  }
  0x77   : > { %1888 = vmatpush3.bf16.msra.mxu0 %v2108_v2  ;;  %v710_v7 = vpack.c.bf16 %v2642_v6, %v2642_v6  ;;  %1896 = vmatpush3.bf16.msra.mxu1 %v2110_v5  ;;  %v1058_v2 = vsel %vm848_vm4, %v893_v62, 0  ;;  %s2375_s30 = smov 72   ;;  %s2883_s11 = sld [smem:[#allocation28_spill]] }
  0x78   : > { %1901 = vmatprep.subr.bf16.mxu0 %v2367_v0  ;;  %1907 = vmatprep.subr.bf16.mxu1 %v2367_v0  ;;  %s2884_s17 = sld [smem:[#allocation29_spill]]  ;;  %s1844_s6 = sshll.u32 %s2350_s24, 7 }
  0x79   : > { %s2376_s15 = smov [#allocation12]  }
  0x7a   : > { %1890 = vmatmul.mubr.msk.bf16.vlgmr.msra.gmra.mxu0 %vm662_vm1, %v638_v4  ;;  %1898 = vmatmul.mubr.msk.bf16.vlgmr.msra.gmra.mxu1 %vm662_vm1, %v710_v7 }
  0x7b   : > { %1903 = vmatprep.mubr.msk.bf16.mxu0 %vm2368_vm0, %v2367_v0  ;;  %1909 = vmatprep.mubr.msk.bf16.mxu1 %vm2368_vm0, %v2367_v0 }
 0x13a   : > { %v700_v9 = vpop.f32.mrf.mxu0  ;;  %v772_v13 = vpop.f32.mrf.mxu1 }
 0x13b   : > { %v701_v10 = vadd.f32 %v1807_v8, %v700_v9  ;;  %v773_v21 = vadd.f32 %v1811_v19, %v772_v13 }
 0x13c   : > { %v1891_v11 = vpop.f32.mrf.mxu0  ;;  %v1899_v15 = vpop.f32.mrf.mxu1 }
 0x13d   : > { %v706_v12 = vpack.c.bf16 %v701_v10, %v701_v10  ;;  %v2666_v24 = vpack.c.bf16 %v773_v21, %v773_v21 }
 0x13e   : > { %v703_v14 = vpop.f32.mrf.mxu0  ;;  %v775_v17 = vpop.f32.mrf.mxu1 }
 0x13f   : > { %708 = vst.msk [vmem:[#allocation2] sm:$0xf] %vm707_vm2, %v706_v12 }
 0x140   : > { %v1892_v16 = vpop.f32.mrf.mxu0  ;;  %v1900_v18 = vpop.f32.mrf.mxu1 }
 0x146   : > { %v779_v20 = vld [vmem:[#allocation2] sm:$0xf] }
 0x147   : > { %v785_v22 = vsel %vm780_vm3, %v779_v20, 0  ;;  %v2662_v23 = vcombine.low %v779_v20, %v779_v20 }
 0x148   : > { %1902 = vmatpush3.bf16.xpose.msra.mxu0 %v785_v22 }
 0x149   : > { %897 = vrot.lane.b32.xlu0 %v2662_v23, %s2369_s9  ;;  %1913 = vmatprep.subr.bf16.mxu0 %v2367_v0 }
 0x14d   : > { %895 = vrot.lane.b32.xlu0 %v2666_v24, %s2369_s9 }
 0x14f   : > { %1904 = vmatmul.mubr.msk.bf16.vlgmr.msra.gmra.mxu0 %vm780_vm3, %v2666_v24 }
 0x150   : > { %1915 = vmatprep.mubr.msk.bf16.mxu0 %vm2368_vm0, %v2367_v0 }
 0x1bb   : > { %v898_v25 = vpop.permute.xlu0 %897 }
 0x1bc   : > { %v903_v26 = vsel %vm780_vm3, %v898_v25, 0 }
 0x1bd   : > { %1914 = vmatpush3.bf16.xpose.msra.mxu0 %v903_v26 }
 0x1be   : > { %1925 = vmatprep.subr.bf16.mxu0 %v2367_v0 }
 0x1bf   : > { %v896_v27 = vpop.permute.xlu0 %895 }
 0x1c4   : > { %1916 = vmatmul.mubr.msk.bf16.vlgmr.msra.gmra.mxu0 %vm780_vm3, %v896_v27 }
 0x1c5   : > { %1927 = vmatprep.mubr.msk.bf16.mxu0 %vm2368_vm0, %v2367_v0  ;;  %1926 = vmatpush3.bf16.msra.mxu0 %v1012_v57 }
 0x1c6   : > { %1937 = vmatprep.subr.bf16.mxu0 %v2367_v0 }
 0x20f   : > { %v821_v28 = vpop.f32.mrf.mxu0 }
 0x210   : > { %v827_v29 = vmul.f32 0.35355338, %v821_v28 }
 0x211   : > { %v1905_v30 = vpop.f32.mrf.mxu0 }
 0x212   : > { %v828_v31 = vsel %vm780_vm3, %v827_v29, -inf }
 0x213   : > { %829 = vmax.xlane.f32.xlu1 %v828_v31  ;;  %v824_v32 = vpop.f32.mrf.mxu0 }
 0x215   : > { %v1906_v33 = vpop.f32.mrf.mxu0 }
 0x284   : > { %v939_v34 = vpop.f32.mrf.mxu0 }
 0x285   : > { %v945_v35 = vmul.f32 0.35355338, %v939_v34 }
 0x286   : > { %v1917_v36 = vpop.f32.mrf.mxu0 }
 0x287   : > { %v946_v37 = vsel %vm780_vm3, %v945_v35, -inf }
 0x288   : > { %947 = vmax.xlane.f32.xlu1 %v946_v37  ;;  %v942_v38 = vpop.f32.mrf.mxu0 }
 0x28a   : > { %v1918_v39 = vpop.f32.mrf.mxu0 }
 0x299   : > { %843 = vrot.lane.b32.xlu1 %v2662_v23, %s2370_s21  ;;  %s2885_s21 = sld [smem:[#allocation30_spill]] }
 0x29c   : > { %v830_v40 = vpop.xlane.xlu1 %829 }
 0x29d   : > { %v831_v41 = vsub.f32 %v827_v29, %v830_v40 }
 0x29f   : > { %v832_v42 = vmul.f32 1.442695, %v831_v41 }
 0x2a1   : > { %2118 = vpow2.f32 %v832_v42 }
 0x2ae   : > { %v2119_v43 = vpop.eup %2118 }
 0x2af   : > { %v834_v44 = vsel %vm780_vm3, %v2119_v43, 0.0 }
 0x2b0   : > { %835 = vadd.xlane.f32.xlu0 %v834_v44 }
 0x311   : > { %v948_v45 = vpop.xlane.xlu1 %947 }
 0x312   : > { %v949_v46 = vsub.f32 %v945_v35, %v948_v45 }
 0x314   : > { %v950_v47 = vmul.f32 1.442695, %v949_v46  ;;  %v1212_v46 = vld [vmem:[#allocation6 + $0x8] sm:$0xf] }
 0x315   : > { %v844_v48 = vpop.permute.xlu1 %843 }
 0x316   : > { %2120 = vpow2.f32 %v950_v47  ;;  %v850_v49 = vsel %vm848_vm4, %v844_v48, 0  ;;  %v1217_v47 = vsel %vm848_vm4, %v1212_v46, 0 }
 0x317   : > { %1908 = vmatpush3.bf16.msra.mxu1 %v850_v49 }
 0x318   : > { %1919 = vmatprep.subr.bf16.mxu1 %v2367_v0 }
 0x323   : > { %v2121_v50 = vpop.eup %2120 }
 0x324   : > { %v952_v51 = vsel %vm780_vm3, %v2121_v50, 0.0 }
 0x325   : > { %953 = vadd.xlane.f32.xlu1 %v952_v51 }
 0x336   : > { %958 = vrot.lane.b32.xlu1 %v2662_v23, %s2371_s29  ;;  %s2886_s29 = smov %s2885_s21 }
 0x339   : > { %v836_v52 = vpop.xlane.xlu0 %835 }
 0x33a   : > { %2122 = vrcp.f32 %v836_v52  ;;  %1102 = vrot.lane.b32.xlu1 %v2662_v23, %s2372_s28 }
 0x33e   : > { %1100 = vrot.lane.b32.xlu1 %v2666_v24, %s2372_s28  ;;  %s1655_s28 = scalar_lea.hbm %s2885_s21, %s1844_s6 }
 0x347   : > { %v2123_v53 = vpop.eup %2122 }
 0x348   : > { %v838_v54 = vmul.f32 %v2123_v53, %v2119_v43 }
 0x34a   : > { %v839_v55 = vpack.c.bf16 %v838_v54, %v838_v54 }
 0x34c   : > { %1910 = vmatmul.mubr.msk.bf16.vlgmr.msra.gmra.mxu1 %vm780_vm3, %v839_v55 }
 0x34d   : > { %1921 = vmatprep.mubr.msk.bf16.mxu1 %vm2368_vm0, %v2367_v0 }
 0x3ae   : > { %v954_v58 = vpop.xlane.xlu1 %953 }
 0x3af   : > { %2124 = vrcp.f32 %v954_v58 }
 0x3b2   : > { %v959_v59 = vpop.permute.xlu1 %958 }
 0x3b3   : > { %v964_v60 = vsel %vm848_vm4, %v959_v59, 0 }
 0x3b4   : > { %1920 = vmatpush3.bf16.msra.mxu1 %v964_v60 }
 0x3b5   : > { %1931 = vmatprep.subr.bf16.mxu1 %v2367_v0 }
 0x3b6   : > { %v1103_v9 = vpop.permute.xlu1 %1102 }
 0x3b7   : > { %v1108_v13 = vsel %vm780_vm3, %v1103_v9, 0 }
 0x3ba   : > { %v1101_v16 = vpop.permute.xlu1 %1100 }
 0x3bc   : > { %v2125_v61 = vpop.eup %2124 }
 0x3bd   : > { %v956_v63 = vmul.f32 %v2125_v61, %v2121_v50 }
 0x3bf   : > { %v957_v1 = vpack.c.bf16 %v956_v63, %v956_v63 }
 0x3c1   : > { %1922 = vmatmul.mubr.msk.bf16.vlgmr.msra.gmra.mxu1 %vm780_vm3, %v957_v1 }
 0x3c2   : > { %1932 = vmatpush3.bf16.msra.mxu1 %v1058_v2  ;;  %1933 = vmatprep.mubr.msk.bf16.mxu1 %vm2368_vm0, %v2367_v0 }
 0x3c3   : > { %1943 = vmatprep.subr.bf16.mxu1 %v2367_v0 }
 0x40c   : > { %v886_v3 = vpop.f32.mrf.mxu1 }
 0x40d   : > { %v892_v4 = vpack.c.bf16 %v886_v3, %v886_v3 }
 0x40e   : > { %v1911_v5 = vpop.f32.mrf.mxu1 }
 0x40f   : > { %1934 = vmatmul.mubr.msk.bf16.vlgmr.msra.gmra.mxu1 %vm780_vm3, %v892_v4  ;;  %v1372_v5 = vld [vmem:[#allocation6 + $0xc] sm:$0xf] }
 0x410   : > { %v889_v7 = vpop.f32.mrf.mxu1  ;;  %1945 = vmatprep.mubr.msk.bf16.mxu1 %vm2368_vm0, %v2367_v0 }
 0x411   : > { %v1377_v7 = vsel %vm848_vm4, %v1372_v5, 0 }
 0x412   : > { %v1912_v8 = vpop.f32.mrf.mxu1 }
 0x481   : > { %v1000_v10 = vpop.f32.mrf.mxu1 }
 0x482   : > { %v1006_v11 = vpack.c.bf16 %v1000_v10, %v1000_v10 }
 0x483   : > { %v1923_v12 = vpop.f32.mrf.mxu1 }
 0x484   : > { %1928 = vmatmul.mubr.msk.bf16.vlgmr.msra.gmra.mxu0 %vm780_vm3, %v1006_v11 }
 0x485   : > { %1938 = vmatpush3.bf16.xpose.msra.mxu0 %v1108_v13  ;;  %v1003_v14 = vpop.f32.mrf.mxu1  ;;  %1939 = vmatprep.mubr.msk.bf16.mxu0 %vm2368_vm0, %v2367_v0 }
 0x486   : > { %1949 = vmatprep.subr.bf16.mxu0 %v2367_v0 }
 0x487   : > { %v1924_v15 = vpop.f32.mrf.mxu1 }
 0x48c   : > { %1940 = vmatmul.mubr.msk.bf16.vlgmr.msra.gmra.mxu0 %vm780_vm3, %v1101_v16 }
 0x48d   : > { %1951 = vmatprep.mubr.msk.bf16.mxu0 %vm2368_vm0, %v2367_v0  ;;  %1950 = vmatpush3.bf16.msra.mxu0 %v1217_v47 }
 0x48e   : > { %1961 = vmatprep.subr.bf16.mxu0 %v2367_v0 }
 0x4cf   : > { %v2711_v17 = vpop.f32.mrf.mxu1 }
 0x4d1   : > { %v1935_v18 = vpop.f32.mrf.mxu1 }
 0x4d3   : > { %v1097_v19 = vpop.f32.mrf.mxu1 }
 0x4d5   : > { %v1936_v20 = vpop.f32.mrf.mxu1 }
 0x544   : > { %v2713_v21 = vpop.f32.mrf.mxu0 }
 0x545   : > { %v1095_v1 = vadd.f32 %v2711_v17, %v2713_v21  ;;  %v1828_v21 = vld [vmem:[#allocation8] ss:$0 sm:$0xff] }
 0x546   : > { %v1929_v22 = vpop.f32.mrf.mxu0 }
 0x548   : > { %v1051_v25 = vpop.f32.mrf.mxu0 }
 0x54a   : > { %v1930_v26 = vpop.f32.mrf.mxu0 }
 0x54c   : > { %v1144_v27 = vpop.f32.mrf.mxu0 }
 0x54d   : > { %v1150_v28 = vmul.f32 0.35355338, %v1144_v27 }
 0x54e   : > { %v1941_v29 = vpop.f32.mrf.mxu0 }
 0x54f   : > { %v1151_v30 = vsel %vm780_vm3, %v1150_v28, -inf }
 0x550   : > { %1152 = vmax.xlane.f32.xlu0 %v1151_v30  ;;  %v1147_v31 = vpop.f32.mrf.mxu0 }
 0x552   : > { %v1942_v32 = vpop.f32.mrf.mxu0 }
 0x566   : > { %1163 = vrot.lane.b32.xlu0 %v2662_v23, %s2373_s14  ;;  %s2881_s14 = sld [smem:[#allocation27_spill]] }
 0x56a   : > { %1262 = vrot.lane.b32.xlu0 %v2662_v23, %s2374_s19 }
 0x56e   : > { %1260 = vrot.lane.b32.xlu0 %v2666_v24, %s2374_s19  ;;  %s1805_s19 = sshll.u32 %s2602_s7, 3 }
 0x56f   : > { %s625_s8 = scalar_lea.vmem [#allocation12], %s1805_s19 }
 0x570   : > { %s1657_s25 = sshll.u32 %s625_s8, 4  ;;  %s1658_s25 = int_to_ptr.vmem [resolvable:$true] %s1657_s25 }
 0x571   : > { %s2270_s18 = scalar_lea.vmem %s1658_s25, 128 }
 0x572   : > { %p2271_p1 = scmp.ne.s32.totalorder %s1658_s25, %s2270_s18 }
 0x574   : > { %p2272_p10 = pnand %p2271_p1, %p2572_p12 }
 0x576   : > { %p2273_p0 = pneg %p2272_p10 }
 0x5d9   : > { %v1153_v33 = vpop.xlane.xlu0 %1152 }
 0x5da   : > { %v1154_v34 = vsub.f32 %v1150_v28, %v1153_v33 }
 0x5dc   : > { %v1155_v35 = vmul.f32 1.442695, %v1154_v34 }
 0x5dd   : > { %v1164_v36 = vpop.permute.xlu0 %1163 }
 0x5de   : > { %2126 = vpow2.f32 %v1155_v35  ;;  %v1169_v37 = vsel %vm848_vm4, %v1164_v36, 0  ;;  %v2112_v36 = vld [vmem:[#allocation9 + $0x8] sm:$0xff]  }
 0x5df   : > { %1944 = vmatpush3.bf16.msra.mxu1 %v1169_v37  ;;  %v2113_v37 = vld [vmem:[#allocation9] sm:$0xff]  }
 0x5e0   : > { %1955 = vmatprep.subr.bf16.mxu1 %v2367_v0 }
 0x5e1   : > { %v1263_v43 = vpop.permute.xlu0 %1262 }
 0x5e2   : > { %v1268_v44 = vsel %vm780_vm3, %v1263_v43, 0  ;;  %v1829_v43 = vld [vmem:[%s2841_s12] ss:$0 sm:$0xff] }
 0x5e5   : > { %v1261_v45 = vpop.permute.xlu0 %1260 }
 0x5eb   : > { %v2127_v38 = vpop.eup %2126 }
 0x5ec   : > { %v1157_v39 = vsel %vm780_vm3, %v2127_v38, 0.0 }
 0x5ed   : > { %1158 = vadd.xlane.f32.xlu1 %v1157_v39 }
 0x676   : > { %v1159_v40 = vpop.xlane.xlu1 %1158 }
 0x677   : > { %2128 = vrcp.f32 %v1159_v40 }
 0x684   : > { %v2129_v41 = vpop.eup %2128 }
 0x685   : > { %v1161_v42 = vmul.f32 %v2129_v41, %v2127_v38  ;;  %v2115_v38 = vld [vmem:[%s2839_s10 + $0x10] sm:$0xff]  }
 0x687   : > { %v1162_v24 = vpack.c.bf16 %v1161_v42, %v1161_v42 }
 0x689   : > { %1946 = vmatmul.mubr.msk.bf16.vlgmr.msra.gmra.mxu1 %vm780_vm3, %v1162_v24 }
 0x68a   : > { %1956 = vmatpush3.bf16.xpose.msra.mxu1 %v1268_v44  ;;  %1957 = vmatprep.mubr.msk.bf16.mxu1 %vm2368_vm0, %v2367_v0  ;;  %v1830_v44 = vld [vmem:[%s2842_s13] ss:$0 sm:$0xff] }
 0x68b   : > { %1967 = vmatprep.subr.bf16.mxu1 %v2367_v0 }
 0x691   : > { %1958 = vmatmul.mubr.msk.bf16.vlgmr.msra.gmra.mxu1 %vm780_vm3, %v1261_v45 }
 0x692   : > { %1969 = vmatprep.mubr.msk.bf16.mxu1 %vm2368_vm0, %v2367_v0  ;;  %1968 = vmatpush3.bf16.msra.mxu1 %v1377_v7 }
 0x693   : > { %1981 = vmatprep.subr.bf16.mxu1 %v2367_v0 }
 0x749   : > { %v1205_v48 = vpop.f32.mrf.mxu1 }
 0x74a   : > { %v1211_v49 = vpack.c.bf16 %v1205_v48, %v1205_v48  ;;  %v2116_v48 = vld [vmem:[%s2839_s10 + $0x8] sm:$0xff]  }
 0x74b   : > { %v1947_v50 = vpop.f32.mrf.mxu1 }
 0x74c   : > { %1952 = vmatmul.mubr.msk.bf16.vlgmr.msra.gmra.mxu0 %vm780_vm3, %v1211_v49  ;;  %v2117_v49 = vld [vmem:[%s2839_s10] sm:$0xff]   ;;  %v1831_v50 = vld [vmem:[#allocation11] ss:$0 sm:$0xff] }
 0x74d   : > { %v1208_v51 = vpop.f32.mrf.mxu1  ;;  %1963 = vmatprep.mubr.msk.bf16.mxu0 %vm2368_vm0, %v2367_v0 }
 0x74f   : > { %v1948_v52 = vpop.f32.mrf.mxu1 }
 0x751   : > { %v1304_v53 = vpop.f32.mrf.mxu1 }
 0x752   : > { %v1310_v54 = vmul.f32 0.35355338, %v1304_v53 }
 0x753   : > { %v1959_v55 = vpop.f32.mrf.mxu1 }
 0x754   : > { %v1311_v56 = vsel %vm780_vm3, %v1310_v54, -inf }
 0x755   : > { %1312 = vmax.xlane.f32.xlu0 %v1311_v56  ;;  %v1307_v57 = vpop.f32.mrf.mxu1 }
 0x757   : > { %v1960_v58 = vpop.f32.mrf.mxu1 }
 0x758   : > { %v1835_v58 = vld [vmem:[%s2881_s14] ss:$0 sm:$0xff]  ;;  %s1643_s14 = scalar_lea.sflag [#allocation5], %s2602_s7 }
 0x7de   : > { %v1313_v59 = vpop.xlane.xlu0 %1312 }
 0x7df   : > { %v1314_v60 = vsub.f32 %v1310_v54, %v1313_v59 }
 0x7e1   : > { %v1315_v61 = vmul.f32 1.442695, %v1314_v60 }
 0x7e3   : > { %2130 = vpow2.f32 %v1315_v61 }
 0x7f0   : > { %v2131_v62 = vpop.eup %2130 }
 0x7f1   : > { %v1317_v63 = vsel %vm780_vm3, %v2131_v62, 0.0 }
 0x7f2   : > { %1318 = vadd.xlane.f32.xlu1 %v1317_v63 }
 0x803   : > { %1323 = vrot.lane.b32.xlu1 %v2662_v23, %s2375_s30 }
 0x80c   : > { %v1253_v2 = vpop.f32.mrf.mxu0 }
 0x80d   : > { %v1259_v3 = vadd.f32 %v1253_v2, %v1095_v1 }
 0x80e   : > { %v1953_v4 = vpop.f32.mrf.mxu0 }
 0x810   : > { %v1256_v8 = vpop.f32.mrf.mxu0 }
 0x812   : > { %v1954_v9 = vpop.f32.mrf.mxu0 }
 0x87b   : > { %v1319_v10 = vpop.xlane.xlu1 %1318 }
 0x87c   : > { %2132 = vrcp.f32 %v1319_v10 }
 0x87f   : > { %v1324_v11 = vpop.permute.xlu1 %1323 }
 0x880   : > { %v1329_v12 = vsel %vm848_vm4, %v1324_v11, 0 }
 0x881   : > { %1962 = vmatpush3.bf16.msra.mxu0 %v1329_v12  ;;  %v1841_v12 = vld [vmem:[%s2883_s11] ss:$0 sm:$0xff]  ;;  %s2274_s11 = sshll.u32 %s2376_s15, 4  ;;  %s2275_s11 = int_to_ptr.vmem [resolvable:$false] %s2274_s11 }
 0x882   : > { %1973 = vmatprep.subr.bf16.mxu0 %v2367_v0  ;;  %s2276_s24 = scalar_lea.vmem %s2275_s11, 256  ;;  %p2277_p2 = scmp.lt.s32.totalorder %s1658_s25, %s2275_s11 }
 0x883   : > { %p2278_p7 = scmp.lt.s32.totalorder %s2276_s24, %s2270_s18 }
 0x885   : > { %p2279_p4 = por %p2278_p7, %p2277_p2 }
 0x887   : > { %p2280_p5 = pnand %p2279_p4, %p2273_p0 }
 0x889   : > { %v2133_v23 = vpop.eup %2132 }
 0x88a   : > { %v1321_v13 = vmul.f32 %v2133_v23, %v2131_v62 }
 0x88c   : > { %v1322_v14 = vpack.c.bf16 %v1321_v13, %v1321_v13  ;;  %v1842_v13 = vld [vmem:[%s2884_s17] ss:$0 sm:$0xff] }
 0x88e   : > { %1964 = vmatmul.mubr.msk.bf16.vlgmr.msra.gmra.mxu0 %vm780_vm3, %v1322_v14 }
 0x88f   : > { %1977 = vmatprep.mubr.msk.bf16.mxu0 %vm2368_vm0, %v2367_v0  ;;  %1974 = vmatpush3.bf16.msra.mxu0 %v2112_v36 }
 0x890   : > { %1975 = vmatprep.subr.bf16.mxu0 %v2367_v0 }
 0x893   : > { %1976 = vmatpush3.bf16.msra.mxu0 %v2113_v37 }
 0x94e   : > { %v1365_v15 = vpop.f32.mrf.mxu0 }
 0x94f   : > { %v1371_v16 = vpack.c.bf16 %v1365_v15, %v1365_v15 }
 0x950   : > { %v1965_v17 = vpop.f32.mrf.mxu0 }
 0x951   : > { %1970 = vmatmul.mubr.msk.bf16.vlgmr.msra.gmra.mxu1 %vm780_vm3, %v1371_v16 }
 0x952   : > { %v1368_v18 = vpop.f32.mrf.mxu0  ;;  %1989 = vmatprep.mubr.msk.bf16.mxu1 %vm2368_vm0, %v2367_v0 }
 0x954   : > { %v1966_v19 = vpop.f32.mrf.mxu0 }
 0xa11   : > { %v1413_v20 = vpop.f32.mrf.mxu1 }
 0xa12   : > { %v1419_v22 = vadd.f32 %v1413_v20, %v1259_v3 }
 0xa13   : > { %v1971_v25 = vpop.f32.mrf.mxu1 }
 0xa14   : > { %v1427_v26 = vadd.f32 %v1828_v21, %v1419_v22 }
 0xa15   : > { %v1416_v27 = vpop.f32.mrf.mxu1 }
 0xa16   : > { %v1428_v28 = vadd.f32 %v1427_v26, %v2642_v6  ;;  %v2114_v6 = vld [vmem:[%s2839_s10 + $0x18] sm:$0xff]  }
 0xa17   : > { %v1972_v29 = vpop.f32.mrf.mxu1  ;;  %1982 = vmatpush3.bf16.msra.mxu1 %v2114_v6 }
 0xa18   : > { %v1429_v30 = vsel %vm662_vm1, %v1428_v28, 0.0  ;;  %1983 = vmatprep.subr.bf16.mxu1 %v2367_v0 }
 0xa19   : > { %1430 = vadd.xlane.f32.xlu1 %v1429_v30 }
 0xa1b   : > { %1984 = vmatpush3.bf16.msra.mxu1 %v2115_v38 }
 0xa1c   : > { %1985 = vmatprep.subr.bf16.mxu1 %v2367_v0 }
 0xa1f   : > { %1986 = vmatpush3.bf16.msra.mxu1 %v2116_v48 }
 0xa20   : > { %1987 = vmatprep.subr.bf16.mxu1 %v2367_v0 }
 0xa23   : > { %1988 = vmatpush3.bf16.msra.mxu1 %v2117_v49 }
 0xaa2   : > { %v1431_v31 = vpop.xlane.xlu1 %1430 }
 0xaa3   : > { %v1433_v32 = vmul.f32 0.03125, %v1431_v31 }
 0xaa5   : > { %v1434_v33 = vsub.f32 %v1428_v28, %v1433_v32 }
 0xaa7   : > { %v1435_v34 = vmul.f32 %v1434_v33, %v1434_v33 }
 0xaa9   : > { %v1436_v35 = vsel %vm662_vm1, %v1435_v34, 0.0 }
 0xaaa   : > { %1437 = vadd.xlane.f32.xlu0 %v1436_v35 }
 0xb33   : > { %v1438_v39 = vpop.xlane.xlu0 %1437 }
 0xb34   : > { %v1439_v40 = vmul.f32 0.03125, %v1438_v39 }
 0xb36   : > { %v1440_v41 = vadd.f32 1e-05, %v1439_v40 }
 0xb38   : > { %2134 = vrsqrt.f32 %v1440_v41 }
 0xb45   : > { %v2135_v42 = vpop.eup %2134 }
 0xb46   : > { %v1442_v24 = vmul.f32 %v2135_v42, %v1434_v33 }
 0xb48   : > { %v1450_v45 = vmul.f32 %v1829_v43, %v1442_v24 }
 0xb4a   : > { %v1458_v46 = vadd.f32 %v1830_v44, %v1450_v45 }
 0xb4c   : > { %v1459_v47 = vpack.c.bf16 %v1458_v46, %v1458_v46 }
 0xb4e   : > { %1978 = vmatmul.mubr.msk.bf16.vlgmr.msra.gmra.mxu0 %vm662_vm1, %v1459_v47 }
 0xc0e   : > { %v1520_v51 = vpop.f32.mrf.mxu0 }
 0xc0f   : > { %v1521_v52 = vadd.f32 %v1831_v50, %v1520_v51 }
 0xc10   : > { %v1979_v53 = vpop.f32.mrf.mxu0 }
 0xc11   : > { %v1526_v54 = vmax.f32 %v1521_v52, 0.0 }
 0xc12   : > { %v1523_v55 = vpop.f32.mrf.mxu0 }
 0xc13   : > { %v1527_v56 = vpack.c.bf16 %v1526_v54, %v1526_v54 }
 0xc14   : > { %v1980_v57 = vpop.f32.mrf.mxu0 }
 0xc15   : > { %1990 = vmatmul.mubr.msk.bf16.vlgmr.msra.gmra.mxu1 %vm1567_vm5, %v1527_v56 }
 0xcd5   : > { %v1605_v0 = vpop.f32.mrf.mxu1 }
 0xcd6   : > { %v1606_v59 = vadd.f32 %v1835_v58, %v1605_v0 }
 0xcd7   : > { %v1991_v60 = vpop.f32.mrf.mxu1 }
 0xcd8   : > { %v1611_v61 = vadd.f32 %v1606_v59, %v1458_v46 }
 0xcd9   : > { %v1608_v62 = vpop.f32.mrf.mxu1 }
 0xcda   : > { %v1612_v63 = vsel %vm662_vm1, %v1611_v61, 0.0 }
 0xcdb   : > { %1613 = vadd.xlane.f32.xlu0 %v1612_v63  ;;  %v1992_v1 = vpop.f32.mrf.mxu1 }
 0xd64   : > { %v1614_v2 = vpop.xlane.xlu0 %1613 }
 0xd65   : > { %v1615_v3 = vmul.f32 0.03125, %v1614_v2 }
 0xd67   : > { %v1616_v4 = vsub.f32 %v1611_v61, %v1615_v3 }
 0xd69   : > { %v1617_v5 = vmul.f32 %v1616_v4, %v1616_v4 }
 0xd6b   : > { %v1618_v7 = vsel %vm662_vm1, %v1617_v5, 0.0 }
 0xd6c   : > { %1619 = vadd.xlane.f32.xlu0 %v1618_v7 }
 0xdf5   : > { %v1620_v8 = vpop.xlane.xlu0 %1619 }
 0xdf6   : > { %v1621_v9 = vmul.f32 0.03125, %v1620_v8 }
 0xdf8   : > { %v1622_v10 = vadd.f32 1e-05, %v1621_v9 }
 0xdfa   : > { %2136 = vrsqrt.f32 %v1622_v10 }
 0xe07   : > { %v2137_v11 = vpop.eup %2136 }
 0xe08   : > { %v1624_v23 = vmul.f32 %v2137_v11, %v1616_v4 }
 0xe0a   : > { %v1632_v14 = vmul.f32 %v1841_v12, %v1624_v23 }
 0xe0c   : > { %v1640_v15 = vadd.f32 %v1842_v13, %v1632_v14 }
 0xe0e   : > { %1641 = vst.msk [vmem:[%s625_s8] sm:$0xff] %vm662_vm1, %v1640_v15 }
 0xe0f   : > { %2283 = shalt.err (!%p2280_p5)
}
 0xe10   : > { %s2284_s19 = scalar_lea.hbm %s1655_s28, 128  ;;  %s2288_s27 = scalar_lea.hbm %s2886_s29, 256 }
 0xe11   : > { %p2285_p9 = scmp.ne.s32.totalorder %s1655_s28, %s2284_s19  ;;  %p2289_p13 = scmp.lt.s32.totalorder %s1655_s28, %s2886_s29 }
 0xe12   : > { %p2290_p8 = scmp.lt.s32.totalorder %s2288_s27, %s2284_s19 }
 0xe13   : > { %p2286_p6 = pnand %p2285_p9, %p2572_p12 }
 0xe14   : > { %p2291_p3 = por %p2290_p8, %p2289_p13 }
 0xe15   : > { %p2287_p11 = pneg %p2286_p6 }
 0xe17   : > { %p2292_p1 = pnand %p2291_p3, %p2287_p11 }
 0xe19   : > { %2295 = shalt.err (!%p2292_p1)
}
 0xe1a   : > { %2011 = dma.vmem_to_hbm [thread:$0]  (%p2572_p12), %s1658_s25, 128, %s1655_s28, %s1643_s14  }
 0xe1b PF: > { %s2887_s8 = sld [smem:[#allocation17_spill]]  ;;  %p2888_p10 = scmp.ne.s32.totalorder %s2878_s16, 0 }
 0xe1c   : > { %p2889_p0 = scmp.ge.s32.totalorder %s2358_s26, 2 }
 0xe1e   : > { %p2031_p2 = pnand %p2889_p0, %p2888_p10 }
 0xe20   : > { %p2032_p7 = pneg %p2031_p2 }
 0xe21   : > { %s1669_s0 = sand.u32 1, %s2887_s8  }
 0xe22   : > { %s1670_s9 = scalar_lea.sflag [#allocation5], %s1669_s0 }
 0xe23   : > { %2333 = dma.done.wait (%p2032_p7), %s1670_s9, 128  }
 0xe24   : > { %2335 = vsyncadd (%p2032_p7), %s1670_s9, 4294967168  ;;  %s34_s26 = sadd.s32 1, %s2358_s26   ;;  %s2890_s18 = sld [smem:[#allocation21_spill]] }
 0xe25   : > { %p31_p4 = scmp.ge.s32.totalorder %s34_s26, 4   ;;  %s2891_s24 = sld [smem:[#allocation18_spill]] }
 0xe26   : > { %s2892_s25 = sld [smem:[#allocation19_spill]]  ;;  %s2893_s21 = smov %s2342_s22 }
 0xe27   : > { %s2894_s22 = smov %s2346_s23  ;;  %33 = sbr.rel (!%p31_p4) target bundleno = 18 (0x12), region = 152 }
 0xe2a   : > { %s2895_s23 = smov %s2890_s18 }
 0xe2c   :  { %1675 = vsyncpa [#allocation4], 1 }
 0xe2d   :  { %1677 = vsyncpa [#allocation4 + $0x1], 1 }
 0xe2e   :  { %1678 = vsyncpa [#allocation7], 1 }
 0xe2f   :  { %1679 = vsyncpa [#allocation10], 1 }
 0xe30   :  { %1680 = vsyncpa [#allocation5], 1 }
 0xe31   :  { %1682 = vsyncpa [#allocation5 + $0x1], 1 }

</bundles_post_ra>
